<compile_context>
chip_gen: v7x
topology: tpu7x:2x2x1
jax: 0.10.0
libtpu: 0.0.40
codegen_flags: <defaults>
</compile_context>

<pallas_src>
import math

import jax
import jax.numpy as jnp
from jax.experimental import pallas as pl
from jax.experimental.pallas import tpu as pltpu  # noqa: F401  (TPU backend assumed)

# ---------------- config (small shapes consistent with the module) ----------
B = 2                 # batch
C_IN = 4              # RGB-D channels
IMG = 16              # spatial size
PATCH = 8             # patch size (conv kernel == stride)
HIDDEN = 32           # ViT hidden size
HEADS = 4
HEAD_DIM = HIDDEN // HEADS
MLP = 64              # intermediate size
LAYERS = 2            # encoder depth
NUM_CLASSES = 10
NUM_PATCHES = (IMG // PATCH) ** 2
SEQ = NUM_PATCHES + 1
BS = B * SEQ          # batch folded into rows
CPP = C_IN * PATCH * PATCH
LN_EPS = 1e-12        # HF ViT layer_norm_eps
HEAD_LN_EPS = 1e-5    # torch.nn.LayerNorm default in the heads
NEG_BIG = -1e30       # additive mask value for cross-batch attention


# ---------------- small math helpers (all Mosaic-safe primitives) ------------
def _layernorm(x, g, b, eps):
    mu = jnp.mean(x, axis=-1, keepdims=True)
    xc = x - mu
    var = jnp.mean(xc * xc, axis=-1, keepdims=True)
    return xc * jax.lax.rsqrt(var + eps) * g + b


_SQRT_HALF = 0.7071067811865476


def _erf(x):
    # Abramowitz & Stegun 7.1.26 rational approximation, |err| <= 1.5e-7
    # (exact at f32). Only abs/exp/mul/add/where -> lowers cleanly in Mosaic.
    t = 1.0 / (1.0 + 0.3275911 * jnp.abs(x))
    poly = t * (0.254829592
                + t * (-0.284496736
                       + t * (1.421413741
                              + t * (-1.453152027 + t * 1.061405429))))
    y = 1.0 - poly * jnp.exp(-x * x)
    return jnp.where(x >= 0.0, y, -y)


def _gelu_exact(x):
    # HF ViT uses exact (erf) GELU.
    return 0.5 * x * (1.0 + _erf(x * _SQRT_HALF))


# ---------------- the single fused Pallas kernel -----------------------------
def fused_vit_kernel(
    xa_ref, mask_ref, proj_w_ref, emb_bias_ref,
    wqkv_ref, wo_ref, w1_ref, w2_ref,
    vecs_ref, bqkv_ref, b1_ref,
    lnf_ref, head_w_ref, head_b_ref,
    cls_out_ref, quat_out_ref,
):
    scale = 1.0 / math.sqrt(HEAD_DIM)
    mask = mask_ref[...]                                    # (BS, BS) additive

    # ---- patch embedding (conv-as-matmul) + cls/pos assembly, whole batch ---
    # Rows b*SEQ of xa are all-zeros, so those rows become cls_token + pos[0].
    x = jnp.dot(xa_ref[...], proj_w_ref[...],
                preferred_element_type=jnp.float32) + emb_bias_ref[...]  # (BS, H)

    for l in range(LAYERS):                                 # static layer loop
        vecs = vecs_ref[l]                                  # (6, H)
        ln1_g = vecs[0:1, :]
        ln1_b = vecs[1:2, :]
        ln2_g = vecs[2:3, :]
        ln2_b = vecs[3:4, :]
        bo = vecs[4:5, :]
        b2 = vecs[5:6, :]

        # --- self-attention block (pre-LN), block-diagonal over the batch ---
        xn = _layernorm(x, ln1_g, ln1_b, LN_EPS)
        qkv = (jnp.dot(xn, wqkv_ref[l], preferred_element_type=jnp.float32)
               + bqkv_ref[l])                               # (BS, 3H)

        heads_out = []
        for hh in range(HEADS):                             # static head loop
            c0 = hh * HEAD_DIM
            qh = qkv[:, c0:c0 + HEAD_DIM]
            kh = qkv[:, HIDDEN + c0:HIDDEN + c0 + HEAD_DIM]
            vh = qkv[:, 2 * HIDDEN + c0:2 * HIDDEN + c0 + HEAD_DIM]
            s = jax.lax.dot_general(
                qh, kh, (((1,), (1,)), ((), ())),
                preferred_element_type=jnp.float32) * scale + mask  # (BS, BS)
            s = s - jnp.max(s, axis=-1, keepdims=True)
            e = jnp.exp(s)
            p = e / jnp.sum(e, axis=-1, keepdims=True)      # exact softmax
            heads_out.append(
                jnp.dot(p, vh, preferred_element_type=jnp.float32))  # (BS, Dh)
        o_cat = jnp.concatenate(heads_out, axis=-1)         # (BS, H)
        x = x + jnp.dot(o_cat, wo_ref[l],
                        preferred_element_type=jnp.float32) + bo     # residual

        # --- MLP block (pre-LN) ---
        xn2 = _layernorm(x, ln2_g, ln2_b, LN_EPS)
        mid = (jnp.dot(xn2, w1_ref[l], preferred_element_type=jnp.float32)
               + b1_ref[l])
        mid = _gelu_exact(mid)
        x = x + (jnp.dot(mid, w2_ref[l], preferred_element_type=jnp.float32)
                 + b2)

    # ---- final LayerNorm + merged heads on the CLS rows (rows b*SEQ) --------
    cls = jnp.concatenate([x[b * SEQ:b * SEQ + 1, :] for b in range(B)],
                          axis=0)                            # (B, H)
    lnf = lnf_ref[...]                                       # (2, H) = [g ; b]
    cls = _layernorm(cls, lnf[0:1, :], lnf[1:2, :], LN_EPS)

    # TODO(synk): NormLinearHead assumed to be LayerNorm -> Linear
    # (+ L2-normalized output for the quaternion head only).
    # Shared head-LN standardization; per-head LN gain/bias + Linear bias are
    # folded into head_w / head_b at parameter-prep time.
    mu = jnp.mean(cls, axis=-1, keepdims=True)
    xc = cls - mu
    var = jnp.mean(xc * xc, axis=-1, keepdims=True)
    x_hat = xc * jax.lax.rsqrt(var + HEAD_LN_EPS)

    out = (jnp.dot(x_hat, head_w_ref[...], preferred_element_type=jnp.float32)
           + head_b_ref[...])                                # (B, NC + 4)
    cls_out_ref[...] = out[:, :NUM_CLASSES]

    qv = out[:, NUM_CLASSES:NUM_CLASSES + 4]
    # F.normalize: x / max(||x||_2, eps); exact division keeps unit norm.
    nrm = jnp.maximum(jnp.sqrt(jnp.sum(qv * qv, axis=-1, keepdims=True)), 1e-12)
    quat_out_ref[...] = qv / nrm


# ---------------- parameter-only preprocessing (hoisted out of forward) ------
def prepare_params(params):
    """Fold / pack parameters once at init so forward() only does x-dependent work."""
    pos = params["pos_embed"][0]                                     # (SEQ, H)
    emb = jnp.concatenate(
        [params["cls_token"].reshape(1, HIDDEN) + pos[0:1],
         params["proj_b"] + pos[1:]], axis=0)                        # (SEQ, H)
    emb_bias = jnp.tile(emb, (B, 1))                                 # (BS, H)

    # Block-diagonal additive attention mask: 0 intra-batch, -1e30 cross-batch.
    rb = jnp.repeat(jnp.arange(B), SEQ)
    mask = jnp.where(rb[:, None] == rb[None, :], 0.0, NEG_BIG).astype(jnp.float32)

    # Pack the six (L,1,H) per-layer vectors into one (L,6,H) operand.
    vecs32 = jnp.concatenate(
        [params["ln1_g"], params["ln1_b"],
         params["ln2_g"], params["ln2_b"],
         params["bo"], params["b2"]], axis=1)                        # (L, 6, H)

    lnf = jnp.concatenate([params["lnf_g"], params["lnf_b"]], axis=0)  # (2, H)

    # Fold head LayerNorm gain/bias into the head Linear weights and merge heads.
    cw = params["c_lng"].reshape(HIDDEN, 1) * params["c_w"]          # (H, NC)
    cb = params["c_lnb"] @ params["c_w"] + params["c_b"]             # (1, NC)
    qw = params["q_lng"].reshape(HIDDEN, 1) * params["q_w"]          # (H, 4)
    qb = params["q_lnb"] @ params["q_w"] + params["q_b"]             # (1, 4)
    head_w = jnp.concatenate([cw, qw], axis=1)                       # (H, NC+4)
    head_b = jnp.concatenate([cb, qb], axis=1)                       # (1, NC+4)

    return dict(
        proj_w=params["proj_w"], emb_bias=emb_bias, mask=mask,
        wqkv=params["wqkv"], wo=params["wo"], w1=params["w1"], w2=params["w2"],
        vecs32=vecs32, bqkv=params["bqkv"], b1=params["b1"],
        lnf=lnf, head_w=head_w, head_b=head_b,
    )


# ---------------- wrapper: one pallas_call for the whole forward -------------
def forward(x, pp):
    """x: (B, 4, H, W) NCHW f32 -> (logits (B, NUM_CLASSES), quaternion (B, 4))."""
    assert x.shape == (B, C_IN, IMG, IMG)
    gh = IMG // PATCH

    # conv(k=stride=PATCH, pad=0) == unfold patches + matmul; order (C, kh, kw).
    patches = x.reshape(B, C_IN, gh, PATCH, gh, PATCH)
    patches = patches.transpose(0, 2, 4, 1, 3, 5).reshape(B, NUM_PATCHES, CPP)
    # Prepend an all-zeros "CLS patch" row per batch element, then fold the
    # batch into rows: shape (B*SEQ, CPP), CLS row of batch b at row b*SEQ.
    xa = jnp.concatenate(
        [jnp.zeros((B, 1, CPP), jnp.float32), patches], axis=1
    ).reshape(BS, CPP)

    args = [
        xa, pp["mask"], pp["proj_w"], pp["emb_bias"],
        pp["wqkv"], pp["wo"], pp["w1"], pp["w2"],
        pp["vecs32"], pp["bqkv"], pp["b1"],
        pp["lnf"], pp["head_w"], pp["head_b"],
    ]

    flops = 2 * (
        BS * CPP * HIDDEN
        + LAYERS * (BS * HIDDEN * 3 * HIDDEN
                    + HEADS * 2 * BS * BS * HEAD_DIM
                    + BS * HIDDEN * HIDDEN
                    + 2 * BS * HIDDEN * MLP)
        + B * HIDDEN * (NUM_CLASSES + 4))
    transcendentals = LAYERS * (HEADS * BS * BS + BS * MLP)
    bytes_accessed = 4 * (sum(int(a.size) for a in args) + B * (NUM_CLASSES + 4))

    return pl.pallas_call(
        fused_vit_kernel,
        out_shape=(
            jax.ShapeDtypeStruct((B, NUM_CLASSES), jnp.float32),
            jax.ShapeDtypeStruct((B, 4), jnp.float32),
        ),
        cost_estimate=pl.CostEstimate(
            flops=int(flops),
            transcendentals=int(transcendentals),
            bytes_accessed=int(bytes_accessed)),
    )(*args)


# ---------------- deterministic parameter init -------------------------------
def init_params(key):
    keys = jax.random.split(key, 64)
    it = iter(keys)

    def rnd(shape, scale=0.02):
        return (scale * jax.random.normal(next(it), shape)).astype(jnp.float32)

    ones = lambda s: jnp.ones(s, jnp.float32)
    zeros = lambda s: jnp.zeros(s, jnp.float32)

    # RGB conv weight -> depth channel = mean over RGB -> 4-channel conv weight
    rgb_w = rnd((HIDDEN, 3, PATCH, PATCH))
    depth_w = jnp.mean(rgb_w, axis=1, keepdims=True)
    conv_w = jnp.concatenate([rgb_w, depth_w], axis=1)               # (D, 4, p, p)
    proj_w = conv_w.reshape(HIDDEN, CPP).T                           # (CPP, D)
    proj_b = rnd((1, HIDDEN))

    cls_token = rnd((1, 1, HIDDEN))
    pos_embed = rnd((1, SEQ, HIDDEN))

    ln1_g, ln1_b, wqkv, bqkv, wo, bo = [], [], [], [], [], []
    ln2_g, ln2_b, w1, b1, w2, b2 = [], [], [], [], [], []
    for _ in range(LAYERS):
        wq, wk, wv = rnd((HIDDEN, HIDDEN)), rnd((HIDDEN, HIDDEN)), rnd((HIDDEN, HIDDEN))
        bq, bk, bv = rnd((1, HIDDEN)), rnd((1, HIDDEN)), rnd((1, HIDDEN))
        ln1_g.append(ones((1, HIDDEN))); ln1_b.append(zeros((1, HIDDEN)))
        wqkv.append(jnp.concatenate([wq, wk, wv], axis=1))           # (H, 3H)
        bqkv.append(jnp.concatenate([bq, bk, bv], axis=1))           # (1, 3H)
        wo.append(rnd((HIDDEN, HIDDEN))); bo.append(rnd((1, HIDDEN)))
        ln2_g.append(ones((1, HIDDEN))); ln2_b.append(zeros((1, HIDDEN)))
        w1.append(rnd((HIDDEN, MLP))); b1.append(rnd((1, MLP)))
        w2.append(rnd((MLP, HIDDEN))); b2.append(rnd((1, HIDDEN)))

    stack = lambda xs: jnp.stack(xs, axis=0)

    return dict(
        proj_w=proj_w, proj_b=proj_b,
        cls_token=cls_token, pos_embed=pos_embed,
        ln1_g=stack(ln1_g), ln1_b=stack(ln1_b),
        wqkv=stack(wqkv), bqkv=stack(bqkv),
        wo=stack(wo), bo=stack(bo),
        ln2_g=stack(ln2_g), ln2_b=stack(ln2_b),
        w1=stack(w1), b1=stack(b1), w2=stack(w2), b2=stack(b2),
        lnf_g=ones((1, HIDDEN)), lnf_b=zeros((1, HIDDEN)),
        c_lng=ones((1, HIDDEN)), c_lnb=zeros((1, HIDDEN)),
        c_w=rnd((HIDDEN, NUM_CLASSES)), c_b=zeros((1, NUM_CLASSES)),
        q_lng=ones((1, HIDDEN)), q_lnb=zeros((1, HIDDEN)),
        q_w=rnd((HIDDEN, 4)), q_b=zeros((1, 4)),
    )


if __name__ == "__main__":
    key = jax.random.PRNGKey(0)
    pkey, xkey = jax.random.split(key)
    params = init_params(pkey)
    prepped = prepare_params(params)          # parameter-only work: done once
    x = jax.random.normal(xkey, (B, C_IN, IMG, IMG), dtype=jnp.float32)

    fwd = jax.jit(forward)
    logits, quat = fwd(x, prepped)
    logits = jax.block_until_ready(logits)
    quat = jax.block_until_ready(quat)

    assert logits.shape == (B, NUM_CLASSES)
    assert quat.shape == (B, 4)
    assert bool(jnp.all(jnp.isfinite(logits))) and bool(jnp.all(jnp.isfinite(quat)))
    # quaternion head output is L2-normalized
    assert bool(jnp.allclose(jnp.linalg.norm(quat, axis=-1), 1.0, atol=1e-5))
    print("KERNEL_OK")
</pallas_src>

<mosaic_0001>
module attributes {stable_mosaic.version = 11 : i64} {
  func.func @fused_vit_kernel(%arg0: memref<10x256xf32, #tpu.memory_space<vmem>>, %arg1: memref<10x10xf32, #tpu.memory_space<vmem>>, %arg2: memref<256x32xf32, #tpu.memory_space<vmem>>, %arg3: memref<10x32xf32, #tpu.memory_space<vmem>>, %arg4: memref<2x32x96xf32, #tpu.memory_space<vmem>>, %arg5: memref<2x32x32xf32, #tpu.memory_space<vmem>>, %arg6: memref<2x32x64xf32, #tpu.memory_space<vmem>>, %arg7: memref<2x64x32xf32, #tpu.memory_space<vmem>>, %arg8: memref<2x6x32xf32, #tpu.memory_space<vmem>>, %arg9: memref<2x1x96xf32, #tpu.memory_space<vmem>>, %arg10: memref<2x1x64xf32, #tpu.memory_space<vmem>>, %arg11: memref<2x32xf32, #tpu.memory_space<vmem>>, %arg12: memref<32x14xf32, #tpu.memory_space<vmem>>, %arg13: memref<1x14xf32, #tpu.memory_space<vmem>>, %arg14: memref<2x10xf32, #tpu.memory_space<vmem>>, %arg15: memref<2x4xf32, #tpu.memory_space<vmem>>) attributes {dimension_semantics = [], scalar_prefetch = 0 : i64, scratch_operands = 0 : i64, tpu.core_type = #tpu.core_type<tc>} {
    %c0 = arith.constant 0 : index
    %c0_0 = arith.constant 0 : index
    %0 = vector.load %arg1[%c0, %c0_0] : memref<10x10xf32, #tpu.memory_space<vmem>>, vector<10x10xf32>
    %c0_1 = arith.constant 0 : index
    %c0_2 = arith.constant 0 : index
    %1 = vector.load %arg0[%c0_1, %c0_2] : memref<10x256xf32, #tpu.memory_space<vmem>>, vector<10x256xf32>
    %c0_3 = arith.constant 0 : index
    %c0_4 = arith.constant 0 : index
    %2 = vector.load %arg2[%c0_3, %c0_4] : memref<256x32xf32, #tpu.memory_space<vmem>>, vector<256x32xf32>
    %cst = arith.constant dense<0.000000e+00> : vector<10x32xf32>
    %3 = tpu.matmul %1, %2, %cst {dimension_numbers = #tpu.dot_dimension_numbers<[1], [0], [0], [1], [0, 0, 1, 1], [], []>} : vector<10x256xf32>, vector<256x32xf32>, vector<10x32xf32> -> vector<10x32xf32>
    %c0_5 = arith.constant 0 : index
    %c0_6 = arith.constant 0 : index
    %4 = vector.load %arg3[%c0_5, %c0_6] : memref<10x32xf32, #tpu.memory_space<vmem>>, vector<10x32xf32>
    %5 = arith.addf %3, %4 : vector<10x32xf32>
    %c0_7 = arith.constant 0 : index
    %c0_8 = arith.constant 0 : index
    %c0_9 = arith.constant 0 : index
    %6 = vector.load %arg8[%c0_7, %c0_8, %c0_9] : memref<2x6x32xf32, #tpu.memory_space<vmem>>, vector<1x6x32xf32>
    %7 = vector.shape_cast %6 : vector<1x6x32xf32> to vector<6x32xf32>
    %8 = vector.extract_strided_slice %7 {offsets = [0, 0], sizes = [1, 32], strides = [1, 1]} : vector<6x32xf32> to vector<1x32xf32>
    %9 = vector.extract_strided_slice %7 {offsets = [1, 0], sizes = [1, 32], strides = [1, 1]} : vector<6x32xf32> to vector<1x32xf32>
    %10 = vector.extract_strided_slice %7 {offsets = [2, 0], sizes = [1, 32], strides = [1, 1]} : vector<6x32xf32> to vector<1x32xf32>
    %11 = vector.extract_strided_slice %7 {offsets = [3, 0], sizes = [1, 32], strides = [1, 1]} : vector<6x32xf32> to vector<1x32xf32>
    %12 = vector.extract_strided_slice %7 {offsets = [4, 0], sizes = [1, 32], strides = [1, 1]} : vector<6x32xf32> to vector<1x32xf32>
    %13 = vector.extract_strided_slice %7 {offsets = [5, 0], sizes = [1, 32], strides = [1, 1]} : vector<6x32xf32> to vector<1x32xf32>
    %cst_10 = arith.constant dense<0.000000e+00> : vector<10xf32>
    %14 = vector.multi_reduction <add>, %5, %cst_10 [1] : vector<10x32xf32> to vector<10xf32>
    %15 = vector.shape_cast %14 : vector<10xf32> to vector<10x1xf32>
    %cst_11 = arith.constant 3.200000e+01 : f32
    %16 = vector.broadcast %cst_11 : f32 to vector<10x1xf32>
    %17 = arith.divf %15, %16 : vector<10x1xf32>
    %18 = vector.broadcast %17 : vector<10x1xf32> to vector<10x32xf32>
    %19 = arith.subf %5, %18 : vector<10x32xf32>
    %20 = arith.mulf %19, %19 : vector<10x32xf32>
    %cst_12 = arith.constant dense<0.000000e+00> : vector<10xf32>
    %21 = vector.multi_reduction <add>, %20, %cst_12 [1] : vector<10x32xf32> to vector<10xf32>
    %22 = vector.shape_cast %21 : vector<10xf32> to vector<10x1xf32>
    %cst_13 = arith.constant 3.200000e+01 : f32
    %23 = vector.broadcast %cst_13 : f32 to vector<10x1xf32>
    %24 = arith.divf %22, %23 : vector<10x1xf32>
    %cst_14 = arith.constant 9.99999996E-13 : f32
    %25 = vector.broadcast %cst_14 : f32 to vector<10x1xf32>
    %26 = arith.addf %24, %25 : vector<10x1xf32>
    %27 = math.rsqrt %26 : vector<10x1xf32>
    %28 = vector.broadcast %27 : vector<10x1xf32> to vector<10x32xf32>
    %29 = arith.mulf %19, %28 : vector<10x32xf32>
    %30 = vector.broadcast %8 : vector<1x32xf32> to vector<10x32xf32>
    %31 = arith.mulf %29, %30 : vector<10x32xf32>
    %32 = vector.broadcast %9 : vector<1x32xf32> to vector<10x32xf32>
    %33 = arith.addf %31, %32 : vector<10x32xf32>
    %c0_15 = arith.constant 0 : index
    %c0_16 = arith.constant 0 : index
    %c0_17 = arith.constant 0 : index
    %34 = vector.load %arg4[%c0_15, %c0_16, %c0_17] : memref<2x32x96xf32, #tpu.memory_space<vmem>>, vector<1x32x96xf32>
    %35 = vector.shape_cast %34 : vector<1x32x96xf32> to vector<32x96xf32>
    %cst_18 = arith.constant dense<0.000000e+00> : vector<10x96xf32>
    %36 = tpu.matmul %33, %35, %cst_18 {dimension_numbers = #tpu.dot_dimension_numbers<[1], [0], [0], [1], [0, 0, 1, 1], [], []>} : vector<10x32xf32>, vector<32x96xf32>, vector<10x96xf32> -> vector<10x96xf32>
    %c0_19 = arith.constant 0 : index
    %c0_20 = arith.constant 0 : index
    %c0_21 = arith.constant 0 : index
    %37 = vector.load %arg9[%c0_19, %c0_20, %c0_21] : memref<2x1x96xf32, #tpu.memory_space<vmem>>, vector<1x1x96xf32>
    %38 = vector.shape_cast %37 : vector<1x1x96xf32> to vector<1x96xf32>
    %39 = vector.broadcast %38 : vector<1x96xf32> to vector<10x96xf32>
    %40 = arith.addf %36, %39 : vector<10x96xf32>
    %41 = vector.extract_strided_slice %40 {offsets = [0, 0], sizes = [10, 8], strides = [1, 1]} : vector<10x96xf32> to vector<10x8xf32>
    %42 = vector.extract_strided_slice %40 {offsets = [0, 32], sizes = [10, 8], strides = [1, 1]} : vector<10x96xf32> to vector<10x8xf32>
    %43 = vector.extract_strided_slice %40 {offsets = [0, 64], sizes = [10, 8], strides = [1, 1]} : vector<10x96xf32> to vector<10x8xf32>
    %cst_22 = arith.constant dense<0.000000e+00> : vector<10x10xf32>
    %44 = tpu.matmul %41, %42, %cst_22 {dimension_numbers = #tpu.dot_dimension_numbers<[1], [1], [0], [0], [0, 0, 1, 0], [], []>} : vector<10x8xf32>, vector<10x8xf32>, vector<10x10xf32> -> vector<10x10xf32>
    %cst_23 = arith.constant 0.353553385 : f32
    %45 = vector.broadcast %cst_23 : f32 to vector<10x10xf32>
    %46 = arith.mulf %44, %45 : vector<10x10xf32>
    %47 = arith.addf %46, %0 : vector<10x10xf32>
    %cst_24 = arith.constant dense<0xFF800000> : vector<10xf32>
    %48 = vector.multi_reduction <maximumf>, %47, %cst_24 [1] : vector<10x10xf32> to vector<10xf32>
    %49 = vector.shape_cast %48 : vector<10xf32> to vector<10x1xf32>
    %50 = vector.broadcast %49 : vector<10x1xf32> to vector<10x10xf32>
    %51 = arith.subf %47, %50 : vector<10x10xf32>
    %52 = math.exp %51 : vector<10x10xf32>
    %cst_25 = arith.constant dense<0.000000e+00> : vector<10xf32>
    %53 = vector.multi_reduction <add>, %52, %cst_25 [1] : vector<10x10xf32> to vector<10xf32>
    %54 = vector.shape_cast %53 : vector<10xf32> to vector<10x1xf32>
    %55 = vector.broadcast %54 : vector<10x1xf32> to vector<10x10xf32>
    %56 = arith.divf %52, %55 : vector<10x10xf32>
    %cst_26 = arith.constant dense<0.000000e+00> : vector<10x8xf32>
    %57 = tpu.matmul %56, %43, %cst_26 {dimension_numbers = #tpu.dot_dimension_numbers<[1], [0], [0], [1], [0, 0, 1, 1], [], []>} : vector<10x10xf32>, vector<10x8xf32>, vector<10x8xf32> -> vector<10x8xf32>
    %58 = vector.extract_strided_slice %40 {offsets = [0, 8], sizes = [10, 8], strides = [1, 1]} : vector<10x96xf32> to vector<10x8xf32>
    %59 = vector.extract_strided_slice %40 {offsets = [0, 40], sizes = [10, 8], strides = [1, 1]} : vector<10x96xf32> to vector<10x8xf32>
    %60 = vector.extract_strided_slice %40 {offsets = [0, 72], sizes = [10, 8], strides = [1, 1]} : vector<10x96xf32> to vector<10x8xf32>
    %cst_27 = arith.constant dense<0.000000e+00> : vector<10x10xf32>
    %61 = tpu.matmul %58, %59, %cst_27 {dimension_numbers = #tpu.dot_dimension_numbers<[1], [1], [0], [0], [0, 0, 1, 0], [], []>} : vector<10x8xf32>, vector<10x8xf32>, vector<10x10xf32> -> vector<10x10xf32>
    %cst_28 = arith.constant 0.353553385 : f32
    %62 = vector.broadcast %cst_28 : f32 to vector<10x10xf32>
    %63 = arith.mulf %61, %62 : vector<10x10xf32>
    %64 = arith.addf %63, %0 : vector<10x10xf32>
    %cst_29 = arith.constant dense<0xFF800000> : vector<10xf32>
    %65 = vector.multi_reduction <maximumf>, %64, %cst_29 [1] : vector<10x10xf32> to vector<10xf32>
    %66 = vector.shape_cast %65 : vector<10xf32> to vector<10x1xf32>
    %67 = vector.broadcast %66 : vector<10x1xf32> to vector<10x10xf32>
    %68 = arith.subf %64, %67 : vector<10x10xf32>
    %69 = math.exp %68 : vector<10x10xf32>
    %cst_30 = arith.constant dense<0.000000e+00> : vector<10xf32>
    %70 = vector.multi_reduction <add>, %69, %cst_30 [1] : vector<10x10xf32> to vector<10xf32>
    %71 = vector.shape_cast %70 : vector<10xf32> to vector<10x1xf32>
    %72 = vector.broadcast %71 : vector<10x1xf32> to vector<10x10xf32>
    %73 = arith.divf %69, %72 : vector<10x10xf32>
    %cst_31 = arith.constant dense<0.000000e+00> : vector<10x8xf32>
    %74 = tpu.matmul %73, %60, %cst_31 {dimension_numbers = #tpu.dot_dimension_numbers<[1], [0], [0], [1], [0, 0, 1, 1], [], []>} : vector<10x10xf32>, vector<10x8xf32>, vector<10x8xf32> -> vector<10x8xf32>
    %75 = vector.extract_strided_slice %40 {offsets = [0, 16], sizes = [10, 8], strides = [1, 1]} : vector<10x96xf32> to vector<10x8xf32>
    %76 = vector.extract_strided_slice %40 {offsets = [0, 48], sizes = [10, 8], strides = [1, 1]} : vector<10x96xf32> to vector<10x8xf32>
    %77 = vector.extract_strided_slice %40 {offsets = [0, 80], sizes = [10, 8], strides = [1, 1]} : vector<10x96xf32> to vector<10x8xf32>
    %cst_32 = arith.constant dense<0.000000e+00> : vector<10x10xf32>
    %78 = tpu.matmul %75, %76, %cst_32 {dimension_numbers = #tpu.dot_dimension_numbers<[1], [1], [0], [0], [0, 0, 1, 0], [], []>} : vector<10x8xf32>, vector<10x8xf32>, vector<10x10xf32> -> vector<10x10xf32>
    %cst_33 = arith.constant 0.353553385 : f32
    %79 = vector.broadcast %cst_33 : f32 to vector<10x10xf32>
    %80 = arith.mulf %78, %79 : vector<10x10xf32>
    %81 = arith.addf %80, %0 : vector<10x10xf32>
    %cst_34 = arith.constant dense<0xFF800000> : vector<10xf32>
    %82 = vector.multi_reduction <maximumf>, %81, %cst_34 [1] : vector<10x10xf32> to vector<10xf32>
    %83 = vector.shape_cast %82 : vector<10xf32> to vector<10x1xf32>
    %84 = vector.broadcast %83 : vector<10x1xf32> to vector<10x10xf32>
    %85 = arith.subf %81, %84 : vector<10x10xf32>
    %86 = math.exp %85 : vector<10x10xf32>
    %cst_35 = arith.constant dense<0.000000e+00> : vector<10xf32>
    %87 = vector.multi_reduction <add>, %86, %cst_35 [1] : vector<10x10xf32> to vector<10xf32>
    %88 = vector.shape_cast %87 : vector<10xf32> to vector<10x1xf32>
    %89 = vector.broadcast %88 : vector<10x1xf32> to vector<10x10xf32>
    %90 = arith.divf %86, %89 : vector<10x10xf32>
    %cst_36 = arith.constant dense<0.000000e+00> : vector<10x8xf32>
    %91 = tpu.matmul %90, %77, %cst_36 {dimension_numbers = #tpu.dot_dimension_numbers<[1], [0], [0], [1], [0, 0, 1, 1], [], []>} : vector<10x10xf32>, vector<10x8xf32>, vector<10x8xf32> -> vector<10x8xf32>
    %92 = vector.extract_strided_slice %40 {offsets = [0, 24], sizes = [10, 8], strides = [1, 1]} : vector<10x96xf32> to vector<10x8xf32>
    %93 = vector.extract_strided_slice %40 {offsets = [0, 56], sizes = [10, 8], strides = [1, 1]} : vector<10x96xf32> to vector<10x8xf32>
    %94 = vector.extract_strided_slice %40 {offsets = [0, 88], sizes = [10, 8], strides = [1, 1]} : vector<10x96xf32> to vector<10x8xf32>
    %cst_37 = arith.constant dense<0.000000e+00> : vector<10x10xf32>
    %95 = tpu.matmul %92, %93, %cst_37 {dimension_numbers = #tpu.dot_dimension_numbers<[1], [1], [0], [0], [0, 0, 1, 0], [], []>} : vector<10x8xf32>, vector<10x8xf32>, vector<10x10xf32> -> vector<10x10xf32>
    %cst_38 = arith.constant 0.353553385 : f32
    %96 = vector.broadcast %cst_38 : f32 to vector<10x10xf32>
    %97 = arith.mulf %95, %96 : vector<10x10xf32>
    %98 = arith.addf %97, %0 : vector<10x10xf32>
    %cst_39 = arith.constant dense<0xFF800000> : vector<10xf32>
    %99 = vector.multi_reduction <maximumf>, %98, %cst_39 [1] : vector<10x10xf32> to vector<10xf32>
    %100 = vector.shape_cast %99 : vector<10xf32> to vector<10x1xf32>
    %101 = vector.broadcast %100 : vector<10x1xf32> to vector<10x10xf32>
    %102 = arith.subf %98, %101 : vector<10x10xf32>
    %103 = math.exp %102 : vector<10x10xf32>
    %cst_40 = arith.constant dense<0.000000e+00> : vector<10xf32>
    %104 = vector.multi_reduction <add>, %103, %cst_40 [1] : vector<10x10xf32> to vector<10xf32>
    %105 = vector.shape_cast %104 : vector<10xf32> to vector<10x1xf32>
    %106 = vector.broadcast %105 : vector<10x1xf32> to vector<10x10xf32>
    %107 = arith.divf %103, %106 : vector<10x10xf32>
    %cst_41 = arith.constant dense<0.000000e+00> : vector<10x8xf32>
    %108 = tpu.matmul %107, %94, %cst_41 {dimension_numbers = #tpu.dot_dimension_numbers<[1], [0], [0], [1], [0, 0, 1, 1], [], []>} : vector<10x10xf32>, vector<10x8xf32>, vector<10x8xf32> -> vector<10x8xf32>
    %109 = tpu.concatenate %57, %74, %91, %108 in 1 : vector<10x8xf32>, vector<10x8xf32>, vector<10x8xf32>, vector<10x8xf32> -> vector<10x32xf32>
    %c0_42 = arith.constant 0 : index
    %c0_43 = arith.constant 0 : index
    %c0_44 = arith.constant 0 : index
    %110 = vector.load %arg5[%c0_42, %c0_43, %c0_44] : memref<2x32x32xf32, #tpu.memory_space<vmem>>, vector<1x32x32xf32>
    %111 = vector.shape_cast %110 : vector<1x32x32xf32> to vector<32x32xf32>
    %cst_45 = arith.constant dense<0.000000e+00> : vector<10x32xf32>
    %112 = tpu.matmul %109, %111, %cst_45 {dimension_numbers = #tpu.dot_dimension_numbers<[1], [0], [0], [1], [0, 0, 1, 1], [], []>} : vector<10x32xf32>, vector<32x32xf32>, vector<10x32xf32> -> vector<10x32xf32>
    %113 = arith.addf %5, %112 : vector<10x32xf32>
    %114 = vector.broadcast %12 : vector<1x32xf32> to vector<10x32xf32>
    %115 = arith.addf %113, %114 : vector<10x32xf32>
    %cst_46 = arith.constant dense<0.000000e+00> : vector<10xf32>
    %116 = vector.multi_reduction <add>, %115, %cst_46 [1] : vector<10x32xf32> to vector<10xf32>
    %117 = vector.shape_cast %116 : vector<10xf32> to vector<10x1xf32>
    %cst_47 = arith.constant 3.200000e+01 : f32
    %118 = vector.broadcast %cst_47 : f32 to vector<10x1xf32>
    %119 = arith.divf %117, %118 : vector<10x1xf32>
    %120 = vector.broadcast %119 : vector<10x1xf32> to vector<10x32xf32>
    %121 = arith.subf %115, %120 : vector<10x32xf32>
    %122 = arith.mulf %121, %121 : vector<10x32xf32>
    %cst_48 = arith.constant dense<0.000000e+00> : vector<10xf32>
    %123 = vector.multi_reduction <add>, %122, %cst_48 [1] : vector<10x32xf32> to vector<10xf32>
    %124 = vector.shape_cast %123 : vector<10xf32> to vector<10x1xf32>
    %cst_49 = arith.constant 3.200000e+01 : f32
    %125 = vector.broadcast %cst_49 : f32 to vector<10x1xf32>
    %126 = arith.divf %124, %125 : vector<10x1xf32>
    %cst_50 = arith.constant 9.99999996E-13 : f32
    %127 = vector.broadcast %cst_50 : f32 to vector<10x1xf32>
    %128 = arith.addf %126, %127 : vector<10x1xf32>
    %129 = math.rsqrt %128 : vector<10x1xf32>
    %130 = vector.broadcast %129 : vector<10x1xf32> to vector<10x32xf32>
    %131 = arith.mulf %121, %130 : vector<10x32xf32>
    %132 = vector.broadcast %10 : vector<1x32xf32> to vector<10x32xf32>
    %133 = arith.mulf %131, %132 : vector<10x32xf32>
    %134 = vector.broadcast %11 : vector<1x32xf32> to vector<10x32xf32>
    %135 = arith.addf %133, %134 : vector<10x32xf32>
    %c0_51 = arith.constant 0 : index
    %c0_52 = arith.constant 0 : index
    %c0_53 = arith.constant 0 : index
    %136 = vector.load %arg6[%c0_51, %c0_52, %c0_53] : memref<2x32x64xf32, #tpu.memory_space<vmem>>, vector<1x32x64xf32>
    %137 = vector.shape_cast %136 : vector<1x32x64xf32> to vector<32x64xf32>
    %cst_54 = arith.constant dense<0.000000e+00> : vector<10x64xf32>
    %138 = tpu.matmul %135, %137, %cst_54 {dimension_numbers = #tpu.dot_dimension_numbers<[1], [0], [0], [1], [0, 0, 1, 1], [], []>} : vector<10x32xf32>, vector<32x64xf32>, vector<10x64xf32> -> vector<10x64xf32>
    %c0_55 = arith.constant 0 : index
    %c0_56 = arith.constant 0 : index
    %c0_57 = arith.constant 0 : index
    %139 = vector.load %arg10[%c0_55, %c0_56, %c0_57] : memref<2x1x64xf32, #tpu.memory_space<vmem>>, vector<1x1x64xf32>
    %140 = vector.shape_cast %139 : vector<1x1x64xf32> to vector<1x64xf32>
    %141 = vector.broadcast %140 : vector<1x64xf32> to vector<10x64xf32>
    %142 = arith.addf %138, %141 : vector<10x64xf32>
    %cst_58 = arith.constant 5.000000e-01 : f32
    %143 = vector.broadcast %cst_58 : f32 to vector<10x64xf32>
    %144 = arith.mulf %143, %142 : vector<10x64xf32>
    %cst_59 = arith.constant 0.707106769 : f32
    %145 = vector.broadcast %cst_59 : f32 to vector<10x64xf32>
    %146 = arith.mulf %142, %145 : vector<10x64xf32>
    %147 = math.absf %146 : vector<10x64xf32>
    %cst_60 = arith.constant 0.327591091 : f32
    %148 = vector.broadcast %cst_60 : f32 to vector<10x64xf32>
    %149 = arith.mulf %148, %147 : vector<10x64xf32>
    %cst_61 = arith.constant 1.000000e+00 : f32
    %150 = vector.broadcast %cst_61 : f32 to vector<10x64xf32>
    %151 = arith.addf %150, %149 : vector<10x64xf32>
    %cst_62 = arith.constant 1.000000e+00 : f32
    %152 = vector.broadcast %cst_62 : f32 to vector<10x64xf32>
    %153 = arith.divf %152, %151 : vector<10x64xf32>
    %cst_63 = arith.constant 1.06140542 : f32
    %154 = vector.broadcast %cst_63 : f32 to vector<10x64xf32>
    %155 = arith.mulf %153, %154 : vector<10x64xf32>
    %cst_64 = arith.constant -1.45315206 : f32
    %156 = vector.broadcast %cst_64 : f32 to vector<10x64xf32>
    %157 = arith.addf %156, %155 : vector<10x64xf32>
    %158 = arith.mulf %153, %157 : vector<10x64xf32>
    %cst_65 = arith.constant 1.42141378 : f32
    %159 = vector.broadcast %cst_65 : f32 to vector<10x64xf32>
    %160 = arith.addf %159, %158 : vector<10x64xf32>
    %161 = arith.mulf %153, %160 : vector<10x64xf32>
    %cst_66 = arith.constant -0.284496725 : f32
    %162 = vector.broadcast %cst_66 : f32 to vector<10x64xf32>
    %163 = arith.addf %162, %161 : vector<10x64xf32>
    %164 = arith.mulf %153, %163 : vector<10x64xf32>
    %cst_67 = arith.constant 0.254829586 : f32
    %165 = vector.broadcast %cst_67 : f32 to vector<10x64xf32>
    %166 = arith.addf %165, %164 : vector<10x64xf32>
    %167 = arith.mulf %153, %166 : vector<10x64xf32>
    %cst_68 = arith.constant 0.000000e+00 : f32
    %168 = vector.broadcast %cst_68 : f32 to vector<10x64xf32>
    %169 = arith.subf %168, %146 : vector<10x64xf32>
    %170 = arith.mulf %169, %146 : vector<10x64xf32>
    %171 = math.exp %170 : vector<10x64xf32>
    %172 = arith.mulf %167, %171 : vector<10x64xf32>
    %cst_69 = arith.constant 1.000000e+00 : f32
    %173 = vector.broadcast %cst_69 : f32 to vector<10x64xf32>
    %174 = arith.subf %173, %172 : vector<10x64xf32>
    %cst_70 = arith.constant 0.000000e+00 : f32
    %175 = vector.broadcast %cst_70 : f32 to vector<10x64xf32>
    %176 = arith.cmpf oge, %146, %175 : vector<10x64xf32>
    %cst_71 = arith.constant 0.000000e+00 : f32
    %177 = vector.broadcast %cst_71 : f32 to vector<10x64xf32>
    %178 = arith.subf %177, %174 : vector<10x64xf32>
    %179 = arith.select %176, %174, %178 : vector<10x64xi1>, vector<10x64xf32>
    %cst_72 = arith.constant 1.000000e+00 : f32
    %180 = vector.broadcast %cst_72 : f32 to vector<10x64xf32>
    %181 = arith.addf %180, %179 : vector<10x64xf32>
    %182 = arith.mulf %144, %181 : vector<10x64xf32>
    %c0_73 = arith.constant 0 : index
    %c0_74 = arith.constant 0 : index
    %c0_75 = arith.constant 0 : index
    %183 = vector.load %arg7[%c0_73, %c0_74, %c0_75] : memref<2x64x32xf32, #tpu.memory_space<vmem>>, vector<1x64x32xf32>
    %184 = vector.shape_cast %183 : vector<1x64x32xf32> to vector<64x32xf32>
    %cst_76 = arith.constant dense<0.000000e+00> : vector<10x32xf32>
    %185 = tpu.matmul %182, %184, %cst_76 {dimension_numbers = #tpu.dot_dimension_numbers<[1], [0], [0], [1], [0, 0, 1, 1], [], []>} : vector<10x64xf32>, vector<64x32xf32>, vector<10x32xf32> -> vector<10x32xf32>
    %186 = vector.broadcast %13 : vector<1x32xf32> to vector<10x32xf32>
    %187 = arith.addf %185, %186 : vector<10x32xf32>
    %188 = arith.addf %115, %187 : vector<10x32xf32>
    %c1 = arith.constant 1 : index
    %c0_77 = arith.constant 0 : index
    %c0_78 = arith.constant 0 : index
    %189 = vector.load %arg8[%c1, %c0_77, %c0_78] : memref<2x6x32xf32, #tpu.memory_space<vmem>>, vector<1x6x32xf32>
    %190 = vector.shape_cast %189 : vector<1x6x32xf32> to vector<6x32xf32>
    %191 = vector.extract_strided_slice %190 {offsets = [0, 0], sizes = [1, 32], strides = [1, 1]} : vector<6x32xf32> to vector<1x32xf32>
    %192 = vector.extract_strided_slice %190 {offsets = [1, 0], sizes = [1, 32], strides = [1, 1]} : vector<6x32xf32> to vector<1x32xf32>
    %193 = vector.extract_strided_slice %190 {offsets = [2, 0], sizes = [1, 32], strides = [1, 1]} : vector<6x32xf32> to vector<1x32xf32>
    %194 = vector.extract_strided_slice %190 {offsets = [3, 0], sizes = [1, 32], strides = [1, 1]} : vector<6x32xf32> to vector<1x32xf32>
    %195 = vector.extract_strided_slice %190 {offsets = [4, 0], sizes = [1, 32], strides = [1, 1]} : vector<6x32xf32> to vector<1x32xf32>
    %196 = vector.extract_strided_slice %190 {offsets = [5, 0], sizes = [1, 32], strides = [1, 1]} : vector<6x32xf32> to vector<1x32xf32>
    %cst_79 = arith.constant dense<0.000000e+00> : vector<10xf32>
    %197 = vector.multi_reduction <add>, %188, %cst_79 [1] : vector<10x32xf32> to vector<10xf32>
    %198 = vector.shape_cast %197 : vector<10xf32> to vector<10x1xf32>
    %cst_80 = arith.constant 3.200000e+01 : f32
    %199 = vector.broadcast %cst_80 : f32 to vector<10x1xf32>
    %200 = arith.divf %198, %199 : vector<10x1xf32>
    %201 = vector.broadcast %200 : vector<10x1xf32> to vector<10x32xf32>
    %202 = arith.subf %188, %201 : vector<10x32xf32>
    %203 = arith.mulf %202, %202 : vector<10x32xf32>
    %cst_81 = arith.constant dense<0.000000e+00> : vector<10xf32>
    %204 = vector.multi_reduction <add>, %203, %cst_81 [1] : vector<10x32xf32> to vector<10xf32>
    %205 = vector.shape_cast %204 : vector<10xf32> to vector<10x1xf32>
    %cst_82 = arith.constant 3.200000e+01 : f32
    %206 = vector.broadcast %cst_82 : f32 to vector<10x1xf32>
    %207 = arith.divf %205, %206 : vector<10x1xf32>
    %cst_83 = arith.constant 9.99999996E-13 : f32
    %208 = vector.broadcast %cst_83 : f32 to vector<10x1xf32>
    %209 = arith.addf %207, %208 : vector<10x1xf32>
    %210 = math.rsqrt %209 : vector<10x1xf32>
    %211 = vector.broadcast %210 : vector<10x1xf32> to vector<10x32xf32>
    %212 = arith.mulf %202, %211 : vector<10x32xf32>
    %213 = vector.broadcast %191 : vector<1x32xf32> to vector<10x32xf32>
    %214 = arith.mulf %212, %213 : vector<10x32xf32>
    %215 = vector.broadcast %192 : vector<1x32xf32> to vector<10x32xf32>
    %216 = arith.addf %214, %215 : vector<10x32xf32>
    %c1_84 = arith.constant 1 : index
    %c0_85 = arith.constant 0 : index
    %c0_86 = arith.constant 0 : index
    %217 = vector.load %arg4[%c1_84, %c0_85, %c0_86] : memref<2x32x96xf32, #tpu.memory_space<vmem>>, vector<1x32x96xf32>
    %218 = vector.shape_cast %217 : vector<1x32x96xf32> to vector<32x96xf32>
    %cst_87 = arith.constant dense<0.000000e+00> : vector<10x96xf32>
    %219 = tpu.matmul %216, %218, %cst_87 {dimension_numbers = #tpu.dot_dimension_numbers<[1], [0], [0], [1], [0, 0, 1, 1], [], []>} : vector<10x32xf32>, vector<32x96xf32>, vector<10x96xf32> -> vector<10x96xf32>
    %c1_88 = arith.constant 1 : index
    %c0_89 = arith.constant 0 : index
    %c0_90 = arith.constant 0 : index
    %220 = vector.load %arg9[%c1_88, %c0_89, %c0_90] : memref<2x1x96xf32, #tpu.memory_space<vmem>>, vector<1x1x96xf32>
    %221 = vector.shape_cast %220 : vector<1x1x96xf32> to vector<1x96xf32>
    %222 = vector.broadcast %221 : vector<1x96xf32> to vector<10x96xf32>
    %223 = arith.addf %219, %222 : vector<10x96xf32>
    %224 = vector.extract_strided_slice %223 {offsets = [0, 0], sizes = [10, 8], strides = [1, 1]} : vector<10x96xf32> to vector<10x8xf32>
    %225 = vector.extract_strided_slice %223 {offsets = [0, 32], sizes = [10, 8], strides = [1, 1]} : vector<10x96xf32> to vector<10x8xf32>
    %226 = vector.extract_strided_slice %223 {offsets = [0, 64], sizes = [10, 8], strides = [1, 1]} : vector<10x96xf32> to vector<10x8xf32>
    %cst_91 = arith.constant dense<0.000000e+00> : vector<10x10xf32>
    %227 = tpu.matmul %224, %225, %cst_91 {dimension_numbers = #tpu.dot_dimension_numbers<[1], [1], [0], [0], [0, 0, 1, 0], [], []>} : vector<10x8xf32>, vector<10x8xf32>, vector<10x10xf32> -> vector<10x10xf32>
    %cst_92 = arith.constant 0.353553385 : f32
    %228 = vector.broadcast %cst_92 : f32 to vector<10x10xf32>
    %229 = arith.mulf %227, %228 : vector<10x10xf32>
    %230 = arith.addf %229, %0 : vector<10x10xf32>
    %cst_93 = arith.constant dense<0xFF800000> : vector<10xf32>
    %231 = vector.multi_reduction <maximumf>, %230, %cst_93 [1] : vector<10x10xf32> to vector<10xf32>
    %232 = vector.shape_cast %231 : vector<10xf32> to vector<10x1xf32>
    %233 = vector.broadcast %232 : vector<10x1xf32> to vector<10x10xf32>
    %234 = arith.subf %230, %233 : vector<10x10xf32>
    %235 = math.exp %234 : vector<10x10xf32>
    %cst_94 = arith.constant dense<0.000000e+00> : vector<10xf32>
    %236 = vector.multi_reduction <add>, %235, %cst_94 [1] : vector<10x10xf32> to vector<10xf32>
    %237 = vector.shape_cast %236 : vector<10xf32> to vector<10x1xf32>
    %238 = vector.broadcast %237 : vector<10x1xf32> to vector<10x10xf32>
    %239 = arith.divf %235, %238 : vector<10x10xf32>
    %cst_95 = arith.constant dense<0.000000e+00> : vector<10x8xf32>
    %240 = tpu.matmul %239, %226, %cst_95 {dimension_numbers = #tpu.dot_dimension_numbers<[1], [0], [0], [1], [0, 0, 1, 1], [], []>} : vector<10x10xf32>, vector<10x8xf32>, vector<10x8xf32> -> vector<10x8xf32>
    %241 = vector.extract_strided_slice %223 {offsets = [0, 8], sizes = [10, 8], strides = [1, 1]} : vector<10x96xf32> to vector<10x8xf32>
    %242 = vector.extract_strided_slice %223 {offsets = [0, 40], sizes = [10, 8], strides = [1, 1]} : vector<10x96xf32> to vector<10x8xf32>
    %243 = vector.extract_strided_slice %223 {offsets = [0, 72], sizes = [10, 8], strides = [1, 1]} : vector<10x96xf32> to vector<10x8xf32>
    %cst_96 = arith.constant dense<0.000000e+00> : vector<10x10xf32>
    %244 = tpu.matmul %241, %242, %cst_96 {dimension_numbers = #tpu.dot_dimension_numbers<[1], [1], [0], [0], [0, 0, 1, 0], [], []>} : vector<10x8xf32>, vector<10x8xf32>, vector<10x10xf32> -> vector<10x10xf32>
    %cst_97 = arith.constant 0.353553385 : f32
    %245 = vector.broadcast %cst_97 : f32 to vector<10x10xf32>
    %246 = arith.mulf %244, %245 : vector<10x10xf32>
    %247 = arith.addf %246, %0 : vector<10x10xf32>
    %cst_98 = arith.constant dense<0xFF800000> : vector<10xf32>
    %248 = vector.multi_reduction <maximumf>, %247, %cst_98 [1] : vector<10x10xf32> to vector<10xf32>
    %249 = vector.shape_cast %248 : vector<10xf32> to vector<10x1xf32>
    %250 = vector.broadcast %249 : vector<10x1xf32> to vector<10x10xf32>
    %251 = arith.subf %247, %250 : vector<10x10xf32>
    %252 = math.exp %251 : vector<10x10xf32>
    %cst_99 = arith.constant dense<0.000000e+00> : vector<10xf32>
    %253 = vector.multi_reduction <add>, %252, %cst_99 [1] : vector<10x10xf32> to vector<10xf32>
    %254 = vector.shape_cast %253 : vector<10xf32> to vector<10x1xf32>
    %255 = vector.broadcast %254 : vector<10x1xf32> to vector<10x10xf32>
    %256 = arith.divf %252, %255 : vector<10x10xf32>
    %cst_100 = arith.constant dense<0.000000e+00> : vector<10x8xf32>
    %257 = tpu.matmul %256, %243, %cst_100 {dimension_numbers = #tpu.dot_dimension_numbers<[1], [0], [0], [1], [0, 0, 1, 1], [], []>} : vector<10x10xf32>, vector<10x8xf32>, vector<10x8xf32> -> vector<10x8xf32>
    %258 = vector.extract_strided_slice %223 {offsets = [0, 16], sizes = [10, 8], strides = [1, 1]} : vector<10x96xf32> to vector<10x8xf32>
    %259 = vector.extract_strided_slice %223 {offsets = [0, 48], sizes = [10, 8], strides = [1, 1]} : vector<10x96xf32> to vector<10x8xf32>
    %260 = vector.extract_strided_slice %223 {offsets = [0, 80], sizes = [10, 8], strides = [1, 1]} : vector<10x96xf32> to vector<10x8xf32>
    %cst_101 = arith.constant dense<0.000000e+00> : vector<10x10xf32>
    %261 = tpu.matmul %258, %259, %cst_101 {dimension_numbers = #tpu.dot_dimension_numbers<[1], [1], [0], [0], [0, 0, 1, 0], [], []>} : vector<10x8xf32>, vector<10x8xf32>, vector<10x10xf32> -> vector<10x10xf32>
    %cst_102 = arith.constant 0.353553385 : f32
    %262 = vector.broadcast %cst_102 : f32 to vector<10x10xf32>
    %263 = arith.mulf %261, %262 : vector<10x10xf32>
    %264 = arith.addf %263, %0 : vector<10x10xf32>
    %cst_103 = arith.constant dense<0xFF800000> : vector<10xf32>
    %265 = vector.multi_reduction <maximumf>, %264, %cst_103 [1] : vector<10x10xf32> to vector<10xf32>
    %266 = vector.shape_cast %265 : vector<10xf32> to vector<10x1xf32>
    %267 = vector.broadcast %266 : vector<10x1xf32> to vector<10x10xf32>
    %268 = arith.subf %264, %267 : vector<10x10xf32>
    %269 = math.exp %268 : vector<10x10xf32>
    %cst_104 = arith.constant dense<0.000000e+00> : vector<10xf32>
    %270 = vector.multi_reduction <add>, %269, %cst_104 [1] : vector<10x10xf32> to vector<10xf32>
    %271 = vector.shape_cast %270 : vector<10xf32> to vector<10x1xf32>
    %272 = vector.broadcast %271 : vector<10x1xf32> to vector<10x10xf32>
    %273 = arith.divf %269, %272 : vector<10x10xf32>
    %cst_105 = arith.constant dense<0.000000e+00> : vector<10x8xf32>
    %274 = tpu.matmul %273, %260, %cst_105 {dimension_numbers = #tpu.dot_dimension_numbers<[1], [0], [0], [1], [0, 0, 1, 1], [], []>} : vector<10x10xf32>, vector<10x8xf32>, vector<10x8xf32> -> vector<10x8xf32>
    %275 = vector.extract_strided_slice %223 {offsets = [0, 24], sizes = [10, 8], strides = [1, 1]} : vector<10x96xf32> to vector<10x8xf32>
    %276 = vector.extract_strided_slice %223 {offsets = [0, 56], sizes = [10, 8], strides = [1, 1]} : vector<10x96xf32> to vector<10x8xf32>
    %277 = vector.extract_strided_slice %223 {offsets = [0, 88], sizes = [10, 8], strides = [1, 1]} : vector<10x96xf32> to vector<10x8xf32>
    %cst_106 = arith.constant dense<0.000000e+00> : vector<10x10xf32>
    %278 = tpu.matmul %275, %276, %cst_106 {dimension_numbers = #tpu.dot_dimension_numbers<[1], [1], [0], [0], [0, 0, 1, 0], [], []>} : vector<10x8xf32>, vector<10x8xf32>, vector<10x10xf32> -> vector<10x10xf32>
    %cst_107 = arith.constant 0.353553385 : f32
    %279 = vector.broadcast %cst_107 : f32 to vector<10x10xf32>
    %280 = arith.mulf %278, %279 : vector<10x10xf32>
    %281 = arith.addf %280, %0 : vector<10x10xf32>
    %cst_108 = arith.constant dense<0xFF800000> : vector<10xf32>
    %282 = vector.multi_reduction <maximumf>, %281, %cst_108 [1] : vector<10x10xf32> to vector<10xf32>
    %283 = vector.shape_cast %282 : vector<10xf32> to vector<10x1xf32>
    %284 = vector.broadcast %283 : vector<10x1xf32> to vector<10x10xf32>
    %285 = arith.subf %281, %284 : vector<10x10xf32>
    %286 = math.exp %285 : vector<10x10xf32>
    %cst_109 = arith.constant dense<0.000000e+00> : vector<10xf32>
    %287 = vector.multi_reduction <add>, %286, %cst_109 [1] : vector<10x10xf32> to vector<10xf32>
    %288 = vector.shape_cast %287 : vector<10xf32> to vector<10x1xf32>
    %289 = vector.broadcast %288 : vector<10x1xf32> to vector<10x10xf32>
    %290 = arith.divf %286, %289 : vector<10x10xf32>
    %cst_110 = arith.constant dense<0.000000e+00> : vector<10x8xf32>
    %291 = tpu.matmul %290, %277, %cst_110 {dimension_numbers = #tpu.dot_dimension_numbers<[1], [0], [0], [1], [0, 0, 1, 1], [], []>} : vector<10x10xf32>, vector<10x8xf32>, vector<10x8xf32> -> vector<10x8xf32>
    %292 = tpu.concatenate %240, %257, %274, %291 in 1 : vector<10x8xf32>, vector<10x8xf32>, vector<10x8xf32>, vector<10x8xf32> -> vector<10x32xf32>
    %c1_111 = arith.constant 1 : index
    %c0_112 = arith.constant 0 : index
    %c0_113 = arith.constant 0 : index
    %293 = vector.load %arg5[%c1_111, %c0_112, %c0_113] : memref<2x32x32xf32, #tpu.memory_space<vmem>>, vector<1x32x32xf32>
    %294 = vector.shape_cast %293 : vector<1x32x32xf32> to vector<32x32xf32>
    %cst_114 = arith.constant dense<0.000000e+00> : vector<10x32xf32>
    %295 = tpu.matmul %292, %294, %cst_114 {dimension_numbers = #tpu.dot_dimension_numbers<[1], [0], [0], [1], [0, 0, 1, 1], [], []>} : vector<10x32xf32>, vector<32x32xf32>, vector<10x32xf32> -> vector<10x32xf32>
    %296 = arith.addf %188, %295 : vector<10x32xf32>
    %297 = vector.broadcast %195 : vector<1x32xf32> to vector<10x32xf32>
    %298 = arith.addf %296, %297 : vector<10x32xf32>
    %cst_115 = arith.constant dense<0.000000e+00> : vector<10xf32>
    %299 = vector.multi_reduction <add>, %298, %cst_115 [1] : vector<10x32xf32> to vector<10xf32>
    %300 = vector.shape_cast %299 : vector<10xf32> to vector<10x1xf32>
    %cst_116 = arith.constant 3.200000e+01 : f32
    %301 = vector.broadcast %cst_116 : f32 to vector<10x1xf32>
    %302 = arith.divf %300, %301 : vector<10x1xf32>
    %303 = vector.broadcast %302 : vector<10x1xf32> to vector<10x32xf32>
    %304 = arith.subf %298, %303 : vector<10x32xf32>
    %305 = arith.mulf %304, %304 : vector<10x32xf32>
    %cst_117 = arith.constant dense<0.000000e+00> : vector<10xf32>
    %306 = vector.multi_reduction <add>, %305, %cst_117 [1] : vector<10x32xf32> to vector<10xf32>
    %307 = vector.shape_cast %306 : vector<10xf32> to vector<10x1xf32>
    %cst_118 = arith.constant 3.200000e+01 : f32
    %308 = vector.broadcast %cst_118 : f32 to vector<10x1xf32>
    %309 = arith.divf %307, %308 : vector<10x1xf32>
    %cst_119 = arith.constant 9.99999996E-13 : f32
    %310 = vector.broadcast %cst_119 : f32 to vector<10x1xf32>
    %311 = arith.addf %309, %310 : vector<10x1xf32>
    %312 = math.rsqrt %311 : vector<10x1xf32>
    %313 = vector.broadcast %312 : vector<10x1xf32> to vector<10x32xf32>
    %314 = arith.mulf %304, %313 : vector<10x32xf32>
    %315 = vector.broadcast %193 : vector<1x32xf32> to vector<10x32xf32>
    %316 = arith.mulf %314, %315 : vector<10x32xf32>
    %317 = vector.broadcast %194 : vector<1x32xf32> to vector<10x32xf32>
    %318 = arith.addf %316, %317 : vector<10x32xf32>
    %c1_120 = arith.constant 1 : index
    %c0_121 = arith.constant 0 : index
    %c0_122 = arith.constant 0 : index
    %319 = vector.load %arg6[%c1_120, %c0_121, %c0_122] : memref<2x32x64xf32, #tpu.memory_space<vmem>>, vector<1x32x64xf32>
    %320 = vector.shape_cast %319 : vector<1x32x64xf32> to vector<32x64xf32>
    %cst_123 = arith.constant dense<0.000000e+00> : vector<10x64xf32>
    %321 = tpu.matmul %318, %320, %cst_123 {dimension_numbers = #tpu.dot_dimension_numbers<[1], [0], [0], [1], [0, 0, 1, 1], [], []>} : vector<10x32xf32>, vector<32x64xf32>, vector<10x64xf32> -> vector<10x64xf32>
    %c1_124 = arith.constant 1 : index
    %c0_125 = arith.constant 0 : index
    %c0_126 = arith.constant 0 : index
    %322 = vector.load %arg10[%c1_124, %c0_125, %c0_126] : memref<2x1x64xf32, #tpu.memory_space<vmem>>, vector<1x1x64xf32>
    %323 = vector.shape_cast %322 : vector<1x1x64xf32> to vector<1x64xf32>
    %324 = vector.broadcast %323 : vector<1x64xf32> to vector<10x64xf32>
    %325 = arith.addf %321, %324 : vector<10x64xf32>
    %cst_127 = arith.constant 5.000000e-01 : f32
    %326 = vector.broadcast %cst_127 : f32 to vector<10x64xf32>
    %327 = arith.mulf %326, %325 : vector<10x64xf32>
    %cst_128 = arith.constant 0.707106769 : f32
    %328 = vector.broadcast %cst_128 : f32 to vector<10x64xf32>
    %329 = arith.mulf %325, %328 : vector<10x64xf32>
    %330 = math.absf %329 : vector<10x64xf32>
    %cst_129 = arith.constant 0.327591091 : f32
    %331 = vector.broadcast %cst_129 : f32 to vector<10x64xf32>
    %332 = arith.mulf %331, %330 : vector<10x64xf32>
    %cst_130 = arith.constant 1.000000e+00 : f32
    %333 = vector.broadcast %cst_130 : f32 to vector<10x64xf32>
    %334 = arith.addf %333, %332 : vector<10x64xf32>
    %cst_131 = arith.constant 1.000000e+00 : f32
    %335 = vector.broadcast %cst_131 : f32 to vector<10x64xf32>
    %336 = arith.divf %335, %334 : vector<10x64xf32>
    %cst_132 = arith.constant 1.06140542 : f32
    %337 = vector.broadcast %cst_132 : f32 to vector<10x64xf32>
    %338 = arith.mulf %336, %337 : vector<10x64xf32>
    %cst_133 = arith.constant -1.45315206 : f32
    %339 = vector.broadcast %cst_133 : f32 to vector<10x64xf32>
    %340 = arith.addf %339, %338 : vector<10x64xf32>
    %341 = arith.mulf %336, %340 : vector<10x64xf32>
    %cst_134 = arith.constant 1.42141378 : f32
    %342 = vector.broadcast %cst_134 : f32 to vector<10x64xf32>
    %343 = arith.addf %342, %341 : vector<10x64xf32>
    %344 = arith.mulf %336, %343 : vector<10x64xf32>
    %cst_135 = arith.constant -0.284496725 : f32
    %345 = vector.broadcast %cst_135 : f32 to vector<10x64xf32>
    %346 = arith.addf %345, %344 : vector<10x64xf32>
    %347 = arith.mulf %336, %346 : vector<10x64xf32>
    %cst_136 = arith.constant 0.254829586 : f32
    %348 = vector.broadcast %cst_136 : f32 to vector<10x64xf32>
    %349 = arith.addf %348, %347 : vector<10x64xf32>
    %350 = arith.mulf %336, %349 : vector<10x64xf32>
    %cst_137 = arith.constant 0.000000e+00 : f32
    %351 = vector.broadcast %cst_137 : f32 to vector<10x64xf32>
    %352 = arith.subf %351, %329 : vector<10x64xf32>
    %353 = arith.mulf %352, %329 : vector<10x64xf32>
    %354 = math.exp %353 : vector<10x64xf32>
    %355 = arith.mulf %350, %354 : vector<10x64xf32>
    %cst_138 = arith.constant 1.000000e+00 : f32
    %356 = vector.broadcast %cst_138 : f32 to vector<10x64xf32>
    %357 = arith.subf %356, %355 : vector<10x64xf32>
    %cst_139 = arith.constant 0.000000e+00 : f32
    %358 = vector.broadcast %cst_139 : f32 to vector<10x64xf32>
    %359 = arith.cmpf oge, %329, %358 : vector<10x64xf32>
    %cst_140 = arith.constant 0.000000e+00 : f32
    %360 = vector.broadcast %cst_140 : f32 to vector<10x64xf32>
    %361 = arith.subf %360, %357 : vector<10x64xf32>
    %362 = arith.select %359, %357, %361 : vector<10x64xi1>, vector<10x64xf32>
    %cst_141 = arith.constant 1.000000e+00 : f32
    %363 = vector.broadcast %cst_141 : f32 to vector<10x64xf32>
    %364 = arith.addf %363, %362 : vector<10x64xf32>
    %365 = arith.mulf %327, %364 : vector<10x64xf32>
    %c1_142 = arith.constant 1 : index
    %c0_143 = arith.constant 0 : index
    %c0_144 = arith.constant 0 : index
    %366 = vector.load %arg7[%c1_142, %c0_143, %c0_144] : memref<2x64x32xf32, #tpu.memory_space<vmem>>, vector<1x64x32xf32>
    %367 = vector.shape_cast %366 : vector<1x64x32xf32> to vector<64x32xf32>
    %cst_145 = arith.constant dense<0.000000e+00> : vector<10x32xf32>
    %368 = tpu.matmul %365, %367, %cst_145 {dimension_numbers = #tpu.dot_dimension_numbers<[1], [0], [0], [1], [0, 0, 1, 1], [], []>} : vector<10x64xf32>, vector<64x32xf32>, vector<10x32xf32> -> vector<10x32xf32>
    %369 = vector.broadcast %196 : vector<1x32xf32> to vector<10x32xf32>
    %370 = arith.addf %368, %369 : vector<10x32xf32>
    %371 = arith.addf %298, %370 : vector<10x32xf32>
    %372 = vector.extract_strided_slice %371 {offsets = [0, 0], sizes = [1, 32], strides = [1, 1]} : vector<10x32xf32> to vector<1x32xf32>
    %373 = vector.extract_strided_slice %371 {offsets = [5, 0], sizes = [1, 32], strides = [1, 1]} : vector<10x32xf32> to vector<1x32xf32>
    %374 = tpu.concatenate %372, %373 in 0 : vector<1x32xf32>, vector<1x32xf32> -> vector<2x32xf32>
    %c0_146 = arith.constant 0 : index
    %c0_147 = arith.constant 0 : index
    %375 = vector.load %arg11[%c0_146, %c0_147] : memref<2x32xf32, #tpu.memory_space<vmem>>, vector<2x32xf32>
    %376 = vector.extract_strided_slice %375 {offsets = [0, 0], sizes = [1, 32], strides = [1, 1]} : vector<2x32xf32> to vector<1x32xf32>
    %377 = vector.extract_strided_slice %375 {offsets = [1, 0], sizes = [1, 32], strides = [1, 1]} : vector<2x32xf32> to vector<1x32xf32>
    %cst_148 = arith.constant dense<0.000000e+00> : vector<2xf32>
    %378 = vector.multi_reduction <add>, %374, %cst_148 [1] : vector<2x32xf32> to vector<2xf32>
    %379 = vector.shape_cast %378 : vector<2xf32> to vector<2x1xf32>
    %cst_149 = arith.constant 3.200000e+01 : f32
    %380 = vector.broadcast %cst_149 : f32 to vector<2x1xf32>
    %381 = arith.divf %379, %380 : vector<2x1xf32>
    %382 = vector.broadcast %381 : vector<2x1xf32> to vector<2x32xf32>
    %383 = arith.subf %374, %382 : vector<2x32xf32>
    %384 = arith.mulf %383, %383 : vector<2x32xf32>
    %cst_150 = arith.constant dense<0.000000e+00> : vector<2xf32>
    %385 = vector.multi_reduction <add>, %384, %cst_150 [1] : vector<2x32xf32> to vector<2xf32>
    %386 = vector.shape_cast %385 : vector<2xf32> to vector<2x1xf32>
    %cst_151 = arith.constant 3.200000e+01 : f32
    %387 = vector.broadcast %cst_151 : f32 to vector<2x1xf32>
    %388 = arith.divf %386, %387 : vector<2x1xf32>
    %cst_152 = arith.constant 9.99999996E-13 : f32
    %389 = vector.broadcast %cst_152 : f32 to vector<2x1xf32>
    %390 = arith.addf %388, %389 : vector<2x1xf32>
    %391 = math.rsqrt %390 : vector<2x1xf32>
    %392 = vector.broadcast %391 : vector<2x1xf32> to vector<2x32xf32>
    %393 = arith.mulf %383, %392 : vector<2x32xf32>
    %394 = vector.broadcast %376 : vector<1x32xf32> to vector<2x32xf32>
    %395 = arith.mulf %393, %394 : vector<2x32xf32>
    %396 = vector.broadcast %377 : vector<1x32xf32> to vector<2x32xf32>
    %397 = arith.addf %395, %396 : vector<2x32xf32>
    %cst_153 = arith.constant dense<0.000000e+00> : vector<2xf32>
    %398 = vector.multi_reduction <add>, %397, %cst_153 [1] : vector<2x32xf32> to vector<2xf32>
    %399 = vector.shape_cast %398 : vector<2xf32> to vector<2x1xf32>
    %cst_154 = arith.constant 3.200000e+01 : f32
    %400 = vector.broadcast %cst_154 : f32 to vector<2x1xf32>
    %401 = arith.divf %399, %400 : vector<2x1xf32>
    %402 = vector.broadcast %401 : vector<2x1xf32> to vector<2x32xf32>
    %403 = arith.subf %397, %402 : vector<2x32xf32>
    %404 = arith.mulf %403, %403 : vector<2x32xf32>
    %cst_155 = arith.constant dense<0.000000e+00> : vector<2xf32>
    %405 = vector.multi_reduction <add>, %404, %cst_155 [1] : vector<2x32xf32> to vector<2xf32>
    %406 = vector.shape_cast %405 : vector<2xf32> to vector<2x1xf32>
    %cst_156 = arith.constant 3.200000e+01 : f32
    %407 = vector.broadcast %cst_156 : f32 to vector<2x1xf32>
    %408 = arith.divf %406, %407 : vector<2x1xf32>
    %cst_157 = arith.constant 9.99999974E-6 : f32
    %409 = vector.broadcast %cst_157 : f32 to vector<2x1xf32>
    %410 = arith.addf %408, %409 : vector<2x1xf32>
    %411 = math.rsqrt %410 : vector<2x1xf32>
    %412 = vector.broadcast %411 : vector<2x1xf32> to vector<2x32xf32>
    %413 = arith.mulf %403, %412 : vector<2x32xf32>
    %c0_158 = arith.constant 0 : index
    %c0_159 = arith.constant 0 : index
    %414 = vector.load %arg12[%c0_158, %c0_159] : memref<32x14xf32, #tpu.memory_space<vmem>>, vector<32x14xf32>
    %cst_160 = arith.constant dense<0.000000e+00> : vector<2x14xf32>
    %415 = tpu.matmul %413, %414, %cst_160 {dimension_numbers = #tpu.dot_dimension_numbers<[1], [0], [0], [1], [0, 0, 1, 1], [], []>} : vector<2x32xf32>, vector<32x14xf32>, vector<2x14xf32> -> vector<2x14xf32>
    %c0_161 = arith.constant 0 : index
    %c0_162 = arith.constant 0 : index
    %416 = vector.load %arg13[%c0_161, %c0_162] : memref<1x14xf32, #tpu.memory_space<vmem>>, vector<1x14xf32>
    %417 = vector.broadcast %416 : vector<1x14xf32> to vector<2x14xf32>
    %418 = arith.addf %415, %417 : vector<2x14xf32>
    %419 = vector.extract_strided_slice %418 {offsets = [0, 0], sizes = [2, 10], strides = [1, 1]} : vector<2x14xf32> to vector<2x10xf32>
    %c0_163 = arith.constant 0 : index
    %c0_164 = arith.constant 0 : index
    %420 = vector.load %arg14[%c0_163, %c0_164] : memref<2x10xf32, #tpu.memory_space<vmem>>, vector<2x10xf32>
    tpu.vector_store %arg14[%c0_163, %c0_164], %419 {strides = array<i32>} : memref<2x10xf32, #tpu.memory_space<vmem>>, vector<2x10xf32>,
    %421 = vector.extract_strided_slice %418 {offsets = [0, 10], sizes = [2, 4], strides = [1, 1]} : vector<2x14xf32> to vector<2x4xf32>
    %422 = arith.mulf %421, %421 : vector<2x4xf32>
    %cst_165 = arith.constant dense<0.000000e+00> : vector<2xf32>
    %423 = vector.multi_reduction <add>, %422, %cst_165 [1] : vector<2x4xf32> to vector<2xf32>
    %424 = vector.shape_cast %423 : vector<2xf32> to vector<2x1xf32>
    %425 = math.sqrt %424 : vector<2x1xf32>
    %cst_166 = arith.constant 9.99999996E-13 : f32
    %426 = vector.broadcast %cst_166 : f32 to vector<2x1xf32>
    %427 = arith.maximumf %425, %426 : vector<2x1xf32>
    %428 = vector.broadcast %427 : vector<2x1xf32> to vector<2x4xf32>
    %429 = arith.divf %421, %428 : vector<2x4xf32>
    %c0_167 = arith.constant 0 : index
    %c0_168 = arith.constant 0 : index
    %430 = vector.load %arg15[%c0_167, %c0_168] : memref<2x4xf32, #tpu.memory_space<vmem>>, vector<2x4xf32>
    tpu.vector_store %arg15[%c0_167, %c0_168], %429 {strides = array<i32>} : memref<2x4xf32, #tpu.memory_space<vmem>>, vector<2x4xf32>,
    return
  }
}

</mosaic_0001>

<bundles_post_ra>
// kernel: forward.1
= control target key start
LH: loop header
LB: loop body
LE: loop exit
PB: predicated region body
PF: predicated region fallthrough
CT: control target
= control target key end

     0   :  { %21 = vsyncpa [#allocation3], 0  ;;  %s4831_s0 = inlined_call_operand.vmem [shape: f32[10,256], index: 0, kind: input, shape index: {}]   ;;  %s4832_s1 = inlined_call_operand.vmem [shape: f32[10,10], index: 1, kind: input, shape index: {}]   ;;  %s4833_s2 = inlined_call_operand.vmem [shape: f32[256,32], index: 2, kind: input, shape index: {}]   ;;  %s4834_s3 = inlined_call_operand.vmem [shape: f32[10,32], index: 3, kind: input, shape index: {}]   ;;  %s4835_s4 = inlined_call_operand.vmem [shape: f32[2,32,96], index: 4, kind: input, shape index: {}]   ;;  %s4836_s5 = inlined_call_operand.vmem [shape: f32[2,32,32], index: 5, kind: input, shape index: {}]   ;;  %s4837_s6 = inlined_call_operand.vmem [shape: f32[2,32,64], index: 6, kind: input, shape index: {}]   ;;  %s4838_s7 = inlined_call_operand.vmem [shape: f32[2,64,32], index: 7, kind: input, shape index: {}]   ;;  %s4839_s8 = inlined_call_operand.vmem [shape: f32[2,6,32], index: 8, kind: input, shape index: {}]   ;;  %s4840_s9 = inlined_call_operand.vmem [shape: f32[2,1,96], index: 9, kind: input, shape index: {}]   ;;  %s4841_s10 = inlined_call_operand.vmem [shape: f32[2,1,64], index: 10, kind: input, shape index: {}]   ;;  %s4842_s11 = inlined_call_operand.vmem [shape: f32[2,32], index: 11, kind: input, shape index: {}]   ;;  %s4843_s12 = inlined_call_operand.vmem [shape: f32[32,14], index: 12, kind: input, shape index: {}]   ;;  %s4844_s13 = inlined_call_operand.vmem [shape: f32[1,14], index: 13, kind: input, shape index: {}]   ;;  %s4845_s14 = inlined_call_operand.hbm [shape: f32[2,10], index: 14, kind: output, shape index: {0}]   ;;  %s4846_s15 = inlined_call_operand.hbm [shape: f32[2,4], index: 15, kind: output, shape index: {1}]  }
   0x1   :  { %v73_v0 = vld [vmem:[%s4833_s2 + $0x80] sm:$0xff]  ;;  %v74_v1 = vld [vmem:[%s4833_s2 + $0x88] sm:$0xff]  ;;  %v75_v5 = vld [vmem:[%s4833_s2 + $0x90] sm:$0xff] }
   0x2   :  { %v57_v2 = vld [vmem:[%s4833_s2] sm:$0xff]  ;;  %v3553_v3 = vpack.c.bf16 %v74_v1, %v73_v0  ;;  %v58_v4 = vld [vmem:[%s4833_s2 + $0x8] sm:$0xff]  ;;  %v76_v6 = vld [vmem:[%s4833_s2 + $0x98] sm:$0xff] }
   0x3   :  { %v3555_v7 = vpack.c.bf16 %v58_v4, %v57_v2  ;;  %v3557_v8 = vpack.c.bf16 %v76_v6, %v75_v5  ;;  %v59_v9 = vld [vmem:[%s4833_s2 + $0x10] sm:$0xff]  ;;  %v60_v10 = vld [vmem:[%s4833_s2 + $0x18] sm:$0xff]  ;;  %v77_v11 = vld [vmem:[%s4833_s2 + $0xa0] sm:$0xff] }
   0x4   :  { %3554 = vmatprep.subr.bf16.mxu0 %v3553_v3  ;;  %v78_v12 = vld [vmem:[%s4833_s2 + $0xa8] sm:$0xff]  ;;  %v3559_v13 = vpack.c.bf16 %v60_v10, %v59_v9  ;;  %v61_v15 = vld [vmem:[%s4833_s2 + $0x20] sm:$0xff]  ;;  %v79_v17 = vld [vmem:[%s4833_s2 + $0xb0] sm:$0xff] }
   0x5   :  { %3556 = vmatpush3.bf16.msra.mxu0 %v3555_v7  ;;  %v3561_v14 = vpack.c.bf16 %v78_v12, %v77_v11  ;;  %v62_v16 = vld [vmem:[%s4833_s2 + $0x28] sm:$0xff]  ;;  %v80_v18 = vld [vmem:[%s4833_s2 + $0xb8] sm:$0xff]  ;;  %v63_v21 = vld [vmem:[%s4833_s2 + $0x30] sm:$0xff] }
   0x6   :  { %3558 = vmatprep.subr.bf16.mxu0 %v3557_v8  ;;  %v3563_v19 = vpack.c.bf16 %v62_v16, %v61_v15  ;;  %v3565_v20 = vpack.c.bf16 %v80_v18, %v79_v17  ;;  %v64_v22 = vld [vmem:[%s4833_s2 + $0x38] sm:$0xff]  ;;  %v81_v23 = vld [vmem:[%s4833_s2 + $0xc0] sm:$0xff]  ;;  %v82_v24 = vld [vmem:[%s4833_s2 + $0xc8] sm:$0xff] }
   0x7   :  { %v54_v25 = vld [vmem:[%s4831_s0 + $0x8] sm:$0xff]  ;;  %v3567_v26 = vpack.c.bf16 %v64_v22, %v63_v21 }
   0x8   :  { %155 = vmatprep.mubr.f32.mxu0 %v54_v25 }
   0x9   :  { %3560 = vmatpush3.bf16.msra.mxu0 %v3559_v13 }
   0xa   :  { %3562 = vmatprep.subr.bf16.mxu0 %v3561_v14 }
   0xd   :  { %3564 = vmatpush3.bf16.msra.mxu0 %v3563_v19 }
   0xe   :  { %22 = vsyncpa [#allocation5], 0  ;;  %3566 = vmatprep.subr.bf16.mxu0 %v3565_v20  ;;  %v3569_v27 = vpack.c.bf16 %v82_v24, %v81_v23  ;;  %v65_v28 = vld [vmem:[%s4833_s2 + $0x40] sm:$0xff]  ;;  %v66_v29 = vld [vmem:[%s4833_s2 + $0x48] sm:$0xff]  ;;  %vm167_vm0 = vcmask 261120   ;;  %vm171_vm1 = vcmask 254976   ;;  %v196_v18 = vlaneseq }
   0xf   :  { %v83_v30 = vld [vmem:[%s4833_s2 + $0xd0] sm:$0xff]  ;;  %v84_v31 = vld [vmem:[%s4833_s2 + $0xd8] sm:$0xff]  ;;  %v3571_v32 = vpack.c.bf16 %v66_v29, %v65_v28  ;;  %v85_v36 = vld [vmem:[%s4833_s2 + $0xe0] sm:$0xff]  ;;  %vm306_vm2 = vcmask 64512   ;;  %s4022_s28 = smov 96   ;;  %s4023_s29 = smov 88  }
  0x10   :  { %v3573_v33 = vpack.c.bf16 %v84_v31, %v83_v30  ;;  %v67_v34 = vld [vmem:[%s4833_s2 + $0x50] sm:$0xff]  ;;  %v68_v35 = vld [vmem:[%s4833_s2 + $0x58] sm:$0xff]  ;;  %v86_v37 = vld [vmem:[%s4833_s2 + $0xe8] sm:$0xff]  ;;  %v4261_v22 = vshrl.u32 %v196_v18, 7  ;;  %s4025_s30 = smov 80   ;;  %s4026_s16 = smov 112  }
  0x11   :  { %3568 = vmatpush3.bf16.msra.mxu0 %v3567_v26  ;;  %v3575_v38 = vpack.c.bf16 %v68_v35, %v67_v34  ;;  %v3577_v39 = vpack.c.bf16 %v86_v37, %v85_v36  ;;  %v69_v40 = vld [vmem:[%s4833_s2 + $0x60] sm:$0xff]  ;;  %v70_v41 = vld [vmem:[%s4833_s2 + $0x68] sm:$0xff]  ;;  %v87_v42 = vld [vmem:[%s4833_s2 + $0xf0] sm:$0xff]  ;;  %vm394_vm4 = vcmask 80896   ;;  %vm398_vm5 = vcmask 74752   ;;  %s4027_s19 = smov 64  }
  0x12   :  { %3570 = vmatprep.subr.bf16.mxu0 %v3569_v27  ;;  %v88_v43 = vld [vmem:[%s4833_s2 + $0xf8] sm:$0xff]  ;;  %v3579_v44 = vpack.c.bf16 %v70_v41, %v69_v40  ;;  %v71_v46 = vld [vmem:[%s4833_s2 + $0x70] sm:$0xff]  ;;  %v53_v49 = vld [vmem:[%s4831_s0] sm:$0xff]  ;;  %v4264_v24 = vsub.s32 0, %v4261_v22  ;;  %v4272_v26 = vsub.s32 1, %v4261_v22  ;;  %vm429_vm6 = vcmask 1041408  }
  0x13   :  { %v3581_v45 = vpack.c.bf16 %v88_v43, %v87_v42  ;;  %v72_v47 = vld [vmem:[%s4833_s2 + $0x78] sm:$0xff]  ;;  %v55_v51 = vld [vmem:[%s4831_s0 + $0x10] sm:$0x3]  ;;  %v89_v53 = vld [vmem:[%s4834_s3] sm:$0xff]  ;;  %s4024_s2 = smov 120   ;;  %vm4028_vm7 = vmmov 1  }
  0x14   :  { %v3583_v48 = vpack.c.bf16 %v72_v47, %v71_v46  ;;  %v56_v50 = vld [vmem:[%s4831_s0 + $0x18] sm:$0x3]  ;;  %v90_v58 = vld [vmem:[%s4834_s3 + $0x8] sm:$0x3]  ;;  %v208_v10 = vld [vmem:[%s4835_s4] sm:$0xff]  ;;  %s4029_s20 = smov 48  }
  0x15   :  { %3572 = vmatpush3.bf16.msra.mxu0 %v3571_v32  ;;  %v209_v11 = vld [vmem:[%s4835_s4 + $0x8] sm:$0xff]  ;;  %v210_v12 = vld [vmem:[%s4835_s4 + $0x10] sm:$0xff]  ;;  %v211_v14 = vld [vmem:[%s4835_s4 + $0x18] sm:$0xff]  ;;  %s4030_s21 = smov 56   ;;  %s4031_s22 = smov 72   ;;  %vm1148_vm9 = vcmask 130048  }
  0x16   :  { %3574 = vmatprep.subr.bf16.mxu0 %v3573_v33  ;;  %v3585_v13 = vpack.c.bf16 %v209_v11, %v208_v10  ;;  %v3589_v15 = vpack.c.bf16 %v211_v14, %v210_v12  ;;  %v4269_v25 = vld [vmem:[%s4839_s8] sm:$0x3f]  ;;  %vm4305_vm3 = vmpackc.low %vm306_vm2, %vm306_vm2  ;;  %s4032_s23 = smov 104   ;;  %s4851_s24 = smov 40   ;;  %vm1151_vm10 = vcmask 195584   ;;  %vm1443_vm13 = vcmask 523264  }
  0x17   :  { %v199_v27 = vrot.slane %v4269_v25, %v4264_v24  ;;  %v205_v30 = vrot.slane %v4269_v25, %v4272_v26  ;;  %v3062_v37 = vld [vmem:[%s4840_s9] ss:$0 sm:$0xff]  ;;  %vm4338_vm8 = vmpackc.low %vm429_vm6, %vm4028_vm7  ;;  %s4849_s25 = smov 8   ;;  %s4847_s26 = smov 16  }
  0x18   :  { %3586 = vmatprep.subr.bf16.mxu1 %v3585_v13  ;;  %s4852_s27 = smov 24   ;;  %s4861_s18 = smov 24  }
  0x19   :  { %3576 = vmatpush3.bf16.msra.mxu0 %v3575_v38  ;;  %3588 = vmatpush3.bf16.msra.mxu1 %v3585_v13 }
  0x1a   :  { %3578 = vmatprep.subr.bf16.mxu0 %v3577_v39  ;;  %3590 = vmatprep.subr.bf16.mxu1 %v3589_v15 }
  0x1d   :  { %3580 = vmatpush3.bf16.msra.mxu0 %v3579_v44  ;;  %3592 = vmatpush3.bf16.msra.mxu1 %v3589_v15 }
  0x1e   :  { %3582 = vmatprep.subr.bf16.mxu0 %v3581_v45 }
  0x21   :  { %3584 = vmatpush3.bf16.msra.mxu0 %v3583_v48 }
  0x24   :  { %156 = vmatmul.mubr.f32.vlgmr.msra.gmra.mrb[0].mxu0 %v53_v49 }
  0x25   :  { %160 = vmatprep.mubr.f32.mxu0 %v56_v50 }
  0x28   :  { %161 = vmatmul.mubr.f32.gmra.mrb[2].mxu0 %v55_v51 }
  0xf7   :  { %v3195_v52 = vpop.f32.mrb[0].mxu0 }
  0xf8   :  { %v3196_v54 = vpop.f32.mrb[1].mxu0 }
  0xf9   :  { %v3197_v55 = vadd.f32 %v3196_v54, %v3195_v52 }
  0xfb   :  { %v4234_v56 = vadd.f32 %v3197_v55, %v89_v53  ;;  %v3198_v57 = vpop.f32.mrb[2].mxu0 }
  0xfc   :  { %v3199_v59 = vpop.f32.mrb[3].mxu0 }
  0xfd   :  { %v3200_v60 = vadd.f32 %v3199_v59, %v3198_v57  ;;  %v168_v61 = vsel %vm167_vm0, %v4234_v56, 0.0 }
  0xfe   :  { %169 = vadd.xlane.f32.xlu0 %v168_v61  ;;  %v4330_v61 = vld [vmem:[%s4832_s1 + $0x8] sm:$0x3] }
  0xff   :  { %v4241_v62 = vadd.f32 %v3200_v60, %v90_v58  ;;  %v4325_v58 = vld [vmem:[%s4832_s1] sm:$0xff] }
 0x101   :  { %v172_v63 = vsel %vm171_vm1, %v4241_v62, 0.0 }
 0x102   :  { %173 = vadd.xlane.f32.xlu0 %v172_v63 }
 0x18b   :  { %v170_v0 = vpop.xlane.xlu0 %169 }
 0x18c   :  { %v176_v1 = vmul.f32 0.03125, %v170_v0 }
 0x18e   :  { %v178_v2 = vsub.f32 %v4234_v56, %v176_v1 }
 0x18f   :  { %v174_v3 = vpop.xlane.xlu0 %173 }
 0x190   :  { %v177_v4 = vmul.f32 0.03125, %v174_v3  ;;  %v180_v5 = vmul.f32 %v178_v2, %v178_v2 }
 0x192   :  { %v179_v6 = vsub.f32 %v4241_v62, %v177_v4  ;;  %v182_v7 = vsel %vm167_vm0, %v180_v5, 0.0 }
 0x193   :  { %183 = vadd.xlane.f32.xlu1 %v182_v7 }
 0x194   :  { %v181_v8 = vmul.f32 %v179_v6, %v179_v6 }
 0x196   :  { %v185_v9 = vsel %vm171_vm1, %v181_v8, 0.0 }
 0x197   :  { %186 = vadd.xlane.f32.xlu1 %v185_v9 }
 0x220   :  { %v184_v16 = vpop.xlane.xlu1 %183 }
 0x221   :  { %v188_v17 = vmul.f32 0.03125, %v184_v16 }
 0x223   :  { %v190_v19 = vadd.f32 1e-12, %v188_v17 }
 0x224   :  { %v187_v20 = vpop.xlane.xlu1 %186 }
 0x225   :  { %3868 = vrsqrt.f32 %v190_v19  ;;  %v189_v21 = vmul.f32 0.03125, %v187_v20 }
 0x227   :  { %v191_v23 = vadd.f32 1e-12, %v189_v21 }
 0x229   :  { %3870 = vrsqrt.f32 %v191_v23 }
 0x22f   :  { %v3869_v28 = vpop.eup %3868 }
 0x230   :  { %v194_v29 = vmul.f32 %v3869_v28, %v178_v2 }
 0x232   :  { %v200_v31 = vmul.f32 %v199_v27, %v194_v29 }
 0x233   :  { %v3871_v32 = vpop.eup %3870 }
 0x234   :  { %v195_v33 = vmul.f32 %v3871_v32, %v179_v6  ;;  %v206_v34 = vadd.f32 %v205_v30, %v200_v31 }
 0x236   :  { %v201_v35 = vmul.f32 %v199_v27, %v195_v33  ;;  %3334 = vmatprep.mubr.msk.f32.mxu1 %vm167_vm0, %v206_v34 }
 0x238   :  { %v207_v36 = vadd.f32 %v205_v30, %v201_v35 }
 0x23a   :  { %3335 = vmatmul.mubr.msk.f32.vlgmr.msra.gmra.mrb[0].mxu1 %vm167_vm0, %v207_v36 }
 0x30d   :  { %v3336_v38 = vpop.f32.mrb[0].mxu1 }
 0x30e   :  { %v4283_v39 = vadd.f32 %v3336_v38, %v3062_v37  ;;  %v291_v40 = vpop.f32.mrb[1].mxu1 }
 0x30f   :  { %v4285_v41 = vadd.f32 %v3062_v37, %v291_v40 }
 0x311   :  { %3341 = vmatprep.mubr.msk.f32.mxu1 %vm306_vm2, %v4285_v41  ;;  %v4291_v42 = vpack.i.bf16 %v4283_v39, %v4285_v41 }
 0x313   :  { %3789 = vrot.lane.b32.xlu0 %v4291_v42, %s4022_s28 }
 0x317   :  { %3799 = vrot.lane.b32.xlu0 %v4291_v42, %s4023_s29 }
 0x31b   :  { %507 = vrot.lane.b32.xlu0 %v4285_v41, %s4024_s2 }
 0x31f   :  { %3804 = vrot.lane.b32.xlu0 %v4291_v42, %s4025_s30 }
 0x323   :  { %712 = vrot.lane.b32.xlu0 %v4285_v41, %s4026_s16 }
 0x385   :  { %v3790_v43 = vpop.permute.xlu0 %3789 }
 0x386   :  { %v3792_v44 = vunpack.i.h.bf16 %v3790_v43  ;;  %v3791_v45 = vunpack.i.l.bf16 %v3790_v43 }
 0x388   :  { %v3593_v47 = vpack.c.bf16 %v3792_v44, %v3791_v45 }
 0x389   :  { %v3800_v48 = vpop.permute.xlu0 %3799 }
 0x38a   :  { %3595 = vmatprep.subr.msk.bf16.mxu1 %vm4305_vm3, %v3593_v47  ;;  %v3802_v9 = vunpack.i.h.bf16 %v3800_v48  ;;  %v3801_v11 = vunpack.i.l.bf16 %v3800_v48 }
 0x38b   :  { %3598 = vmatpush3.bf16.xpose.msk.msra.mxu1 %vm4305_vm3, %v3593_v47 }
 0x38c   :  { %v3605_v16 = vpack.c.bf16 %v3802_v9, %v3801_v11 }
 0x38d   :  { %v4313_v49 = vpop.permute.xlu0 %507 }
 0x391   :  { %v3805_v50 = vpop.permute.xlu0 %3804 }
 0x392   :  { %v3807_v51 = vunpack.i.h.bf16 %v3805_v50  ;;  %v3806_v52 = vunpack.i.l.bf16 %v3805_v50  ;;  %3342 = vmatmul.mubr.msk.f32.vlgmr.msra.gmra.mrb[2].mxu1 %vm306_vm2, %v4283_v39 }
 0x394   :  { %v3617_v53 = vpack.c.bf16 %v3807_v51, %v3806_v52 }
 0x395   :  { %v713_v54 = vpop.permute.xlu0 %712 }
 0x396   :  { %3619 = vmatprep.subr.msk.bf16.mxu0 %vm4305_vm3, %v3617_v53  ;;  %3369 = vmatprep.mubr.msk.f32.mxu0 %vm306_vm2, %v713_v54 }
 0x397   :  { %3622 = vmatpush3.bf16.xpose.msk.msra.mxu0 %vm4305_vm3, %v3617_v53 }
 0x465   :  { %v3343_v55 = vpop.f32.mrb[2].mxu1 }
 0x466   :  { %v381_v57 = vpop.f32.mrb[3].mxu1  ;;  %v391_v59 = vmul.f32 0.35355338, %v3343_v55 }
 0x467   :  { %v390_v60 = vmul.f32 0.35355338, %v381_v57 }
 0x468   :  { %v393_v1 = vadd.f32 %v391_v59, %v4330_v61 }
 0x469   :  { %v392_v63 = vadd.f32 %v390_v60, %v4325_v58 }
 0x46a   :  { %v399_v2 = vsel %vm398_vm5, %v393_v1, -inf }
 0x46b   :  { %v395_v0 = vsel %vm394_vm4, %v392_v63, -inf }
 0x46c   :  { %396 = vmax.xlane.f32.xlu1 %v395_v0 }
 0x470   :  { %400 = vmax.xlane.f32.xlu1 %v399_v2 }
 0x481   :  { %3794 = vrot.lane.b32.xlu1 %v4291_v42, %s4027_s19 }
 0x4f9   :  { %v397_v3 = vpop.xlane.xlu1 %396 }
 0x4fa   :  { %v402_v4 = vsub.f32 %v392_v63, %v397_v3 }
 0x4fc   :  { %v404_v7 = vmul.f32 1.442695, %v402_v4 }
 0x4fd   :  { %v401_v5 = vpop.xlane.xlu1 %400 }
 0x4fe   :  { %v403_v6 = vsub.f32 %v393_v1, %v401_v5 }
 0x500   :  { %v406_v8 = vmul.f32 1.442695, %v403_v6 }
 0x501   :  { %v3795_v10 = vpop.permute.xlu1 %3794 }
 0x502   :  { %3872 = vpow2.f32 %v406_v8  ;;  %v3797_v12 = vunpack.i.h.bf16 %v3795_v10  ;;  %v3796_v13 = vunpack.i.l.bf16 %v3795_v10 }
 0x503   :  { %3874 = vpow2.f32 %v404_v7 }
 0x504   :  { %v3599_v15 = vpack.c.bf16 %v3797_v12, %v3796_v13 }
 0x506   :  { %3601 = vmatprep.subr.msk.bf16.mxu1 %vm4338_vm8, %v3599_v15 }
 0x507   :  { %3604 = vmatpush3.bf16.msk.msra.mxu1 %vm4338_vm8, %v3599_v15 }
 0x508   :  { %3607 = vmatprep.subr.msk.bf16.mxu1 %vm4305_vm3, %v3605_v16 }
 0x50c   :  { %v3873_v17 = vpop.eup %3872 }
 0x50d   :  { %v411_v18 = vsel %vm398_vm5, %v3873_v17, 0.0  ;;  %v3875_v19 = vpop.eup %3874 }
 0x50e   :  { %412 = vadd.xlane.f32.xlu1 %v411_v18  ;;  %v408_v20 = vsel %vm394_vm4, %v3875_v19, 0.0 }
 0x512   :  { %409 = vadd.xlane.f32.xlu1 %v408_v20 }
 0x523   :  { %509 = vrot.lane.b32.xlu1 %v4283_v39, %s4024_s2 }
 0x527   :  { %714 = vrot.lane.b32.xlu1 %v4283_v39, %s4026_s16 }
 0x59b   :  { %v413_v21 = vpop.xlane.xlu1 %412 }
 0x59c   :  { %3876 = vrcp.f32 %v413_v21 }
 0x59f   :  { %v410_v23 = vpop.xlane.xlu1 %409 }
 0x5a0   :  { %3878 = vrcp.f32 %v410_v23 }
 0x5a3   :  { %v510_v27 = vpop.permute.xlu1 %509 }
 0x5a6   :  { %v3877_v29 = vpop.eup %3876 }
 0x5a7   :  { %v715_v28 = vpop.permute.xlu1 %714  ;;  %v417_v32 = vmul.f32 %v3877_v29, %v3873_v17 }
 0x5a8   :  { %3370 = vmatmul.mubr.msk.f32.vlgmr.msra.gmra.mrb[4].mxu0 %vm306_vm2, %v715_v28 }
 0x5aa   :  { %v3879_v30 = vpop.eup %3878 }
 0x5ab   :  { %v415_v31 = vmul.f32 %v3879_v30, %v3875_v19 }
 0x5ad   :  { %3348 = vmatprep.mubr.msk.f32.mxu1 %vm394_vm4, %v415_v31 }
 0x5ae   :  { %3349 = vmatmul.mubr.msk.f32.vlgmr.msra.gmra.mrb[4].mxu1 %vm394_vm4, %v417_v32 }
 0x5af   :  { %3610 = vmatpush3.bf16.xpose.msk.msra.mxu1 %vm4305_vm3, %v3605_v16  ;;  %3355 = vmatprep.mubr.msk.f32.mxu1 %vm306_vm2, %v4313_v49 }
 0x5b6   :  { %3356 = vmatmul.mubr.msk.f32.vlgmr.msra.gmra.mrb[6].mxu1 %vm306_vm2, %v510_v27 }
 0x67b   :  { %v3371_v33 = vpop.f32.mrb[4].mxu0 }
 0x67c   :  { %v794_v34 = vpop.f32.mrb[5].mxu0  ;;  %v804_v49 = vmul.f32 0.35355338, %v3371_v33 }
 0x67d   :  { %v803_v43 = vmul.f32 0.35355338, %v794_v34 }
 0x67e   :  { %v806_v53 = vadd.f32 %v804_v49, %v4330_v61 }
 0x67f   :  { %v805_v51 = vadd.f32 %v803_v43, %v4325_v58 }
 0x680   :  { %v810_v54 = vsel %vm398_vm5, %v806_v53, -inf }
 0x681   :  { %v4362_v35 = vpop.f32.mrb[4].mxu1  ;;  %v807_v52 = vsel %vm394_vm4, %v805_v51, -inf }
 0x682   :  { %v4364_v36 = vpop.f32.mrb[5].mxu1 }
 0x689   :  { %v3357_v37 = vpop.f32.mrb[6].mxu1 }
 0x68a   :  { %v599_v38 = vmul.f32 0.35355338, %v3357_v37  ;;  %v589_v40 = vpop.f32.mrb[7].mxu1 }
 0x68b   :  { %v598_v44 = vmul.f32 0.35355338, %v589_v40 }
 0x68c   :  { %v601_v45 = vadd.f32 %v599_v38, %v4330_v61 }
 0x68d   :  { %v600_v47 = vadd.f32 %v598_v44, %v4325_v58 }
 0x68e   :  { %v605_v48 = vsel %vm398_vm5, %v601_v45, -inf }
 0x68f   :  { %606 = vmax.xlane.f32.xlu1 %v605_v48  ;;  %v602_v50 = vsel %vm394_vm4, %v600_v47, -inf }
 0x690   :  { %603 = vmax.xlane.f32.xlu0 %v602_v50 }
 0x694   :  { %808 = vmax.xlane.f32.xlu0 %v807_v52 }
 0x698   :  { %811 = vmax.xlane.f32.xlu0 %v810_v54 }
 0x71c   :  { %v607_v59 = vpop.xlane.xlu1 %606 }
 0x71d   :  { %v604_v55 = vpop.xlane.xlu0 %603  ;;  %v609_v0 = vsub.f32 %v601_v45, %v607_v59 }
 0x71e   :  { %v608_v57 = vsub.f32 %v600_v47, %v604_v55 }
 0x71f   :  { %v612_v5 = vmul.f32 1.442695, %v609_v0 }
 0x720   :  { %v610_v1 = vmul.f32 1.442695, %v608_v57 }
 0x721   :  { %v809_v60 = vpop.xlane.xlu0 %808 }
 0x722   :  { %v813_v63 = vsub.f32 %v805_v51, %v809_v60 }
 0x724   :  { %v815_v2 = vmul.f32 1.442695, %v813_v63 }
 0x725   :  { %v812_v3 = vpop.xlane.xlu0 %811 }
 0x726   :  { %3880 = vpow2.f32 %v815_v2  ;;  %v814_v4 = vsub.f32 %v806_v53, %v812_v3 }
 0x727   :  { %3882 = vpow2.f32 %v610_v1 }
 0x728   :  { %v817_v6 = vmul.f32 1.442695, %v814_v4 }
 0x72a   :  { %3884 = vpow2.f32 %v817_v6 }
 0x72b   :  { %3886 = vpow2.f32 %v612_v5 }
 0x730   :  { %v3881_v7 = vpop.eup %3880 }
 0x731   :  { %v819_v8 = vsel %vm394_vm4, %v3881_v7, 0.0  ;;  %v3883_v9 = vpop.eup %3882 }
 0x732   :  { %820 = vadd.xlane.f32.xlu0 %v819_v8  ;;  %v614_v11 = vsel %vm394_vm4, %v3883_v9, 0.0 }
 0x734   :  { %v3885_v10 = vpop.eup %3884 }
 0x735   :  { %v822_v12 = vsel %vm398_vm5, %v3885_v10, 0.0  ;;  %v3887_v13 = vpop.eup %3886 }
 0x736   :  { %615 = vadd.xlane.f32.xlu0 %v614_v11  ;;  %823 = vadd.xlane.f32.xlu1 %v822_v12  ;;  %v617_v15 = vsel %vm398_vm5, %v3887_v13, 0.0 }
 0x73a   :  { %618 = vadd.xlane.f32.xlu1 %v617_v15 }
 0x74b   :  { %3814 = vrot.lane.b32.xlu1 %v4291_v42, %s4029_s20 }
 0x74c   :  { %3809 = vrot.lane.b32.xlu0 %v4291_v42, %s4030_s21 }
 0x74f   :  { %3819 = vrot.lane.b32.xlu1 %v4291_v42, %s4031_s22 }
 0x750   :  { %919 = vrot.lane.b32.xlu0 %v4283_v39, %s4032_s23 }
 0x753   :  { %917 = vrot.lane.b32.xlu1 %v4285_v41, %s4032_s23 }
 0x7bf   :  { %v821_v16 = vpop.xlane.xlu0 %820 }
 0x7c3   :  { %v824_v17 = vpop.xlane.xlu1 %823  ;;  %v616_v18 = vpop.xlane.xlu0 %615 }
 0x7c4   :  { %3888 = vrcp.f32 %v616_v18 }
 0x7c5   :  { %3890 = vrcp.f32 %v821_v16 }
 0x7c7   :  { %v619_v19 = vpop.xlane.xlu1 %618  ;;  %v3810_v20 = vpop.permute.xlu0 %3809 }
 0x7c8   :  { %3892 = vrcp.f32 %v619_v19  ;;  %v3812_v21 = vunpack.i.h.bf16 %v3810_v20  ;;  %v3811_v23 = vunpack.i.l.bf16 %v3810_v20 }
 0x7c9   :  { %3894 = vrcp.f32 %v824_v17 }
 0x7ca   :  { %v3611_v27 = vpack.c.bf16 %v3812_v21, %v3811_v23  ;;  %v1154_v23 = vld [vmem:[%s4836_s5] sm:$0xff] }
 0x7cb   :  { %v3815_v28 = vpop.permute.xlu1 %3814  ;;  %v920_v49 = vpop.permute.xlu0 %919 }
 0x7cc   :  { %v3817_v29 = vunpack.i.h.bf16 %v3815_v28  ;;  %v3816_v30 = vunpack.i.l.bf16 %v3815_v28  ;;  %3613 = vmatprep.subr.msk.bf16.mxu1 %vm4338_vm8, %v3611_v27  ;;  %v1156_v28 = vld [vmem:[%s4836_s5 + $0x10] sm:$0xff] }
 0x7cd   :  { %3616 = vmatpush3.bf16.msk.msra.mxu1 %vm4338_vm8, %v3611_v27  ;;  %v1155_v27 = vld [vmem:[%s4836_s5 + $0x8] sm:$0xff] }
 0x7ce   :  { %v3623_v39 = vpack.c.bf16 %v3817_v29, %v3816_v30  ;;  %v3889_v41 = vpop.eup %3888  ;;  %v3641_v29 = vpack.c.bf16 %v1155_v27, %v1154_v23  ;;  %v1157_v30 = vld [vmem:[%s4836_s5 + $0x18] sm:$0xff] }
 0x7cf   :  { %v3820_v31 = vpop.permute.xlu1 %3819  ;;  %v621_v32 = vmul.f32 %v3889_v41, %v3883_v9  ;;  %v3891_v33 = vpop.eup %3890 }
 0x7d0   :  { %3625 = vmatprep.subr.msk.bf16.mxu1 %vm4338_vm8, %v3623_v39  ;;  %v3822_v34 = vunpack.i.h.bf16 %v3820_v31  ;;  %v3821_v37 = vunpack.i.l.bf16 %v3820_v31  ;;  %v826_v44 = vmul.f32 %v3891_v33, %v3881_v7  ;;  %3642 = vmatprep.subr.bf16.mxu0 %v3641_v29 }
 0x7d1   :  { %3362 = vmatprep.mubr.msk.f32.mxu1 %vm394_vm4, %v621_v32  ;;  %3644 = vmatpush3.bf16.msra.mxu0 %v3641_v29 }
 0x7d2   :  { %v3893_v38 = vpop.eup %3892  ;;  %v3629_v45 = vpack.c.bf16 %v3822_v34, %v3821_v37 }
 0x7d3   :  { %v623_v40 = vmul.f32 %v3893_v38, %v3887_v13  ;;  %v3895_v43 = vpop.eup %3894  ;;  %v918_v48 = vpop.permute.xlu1 %917 }
 0x7d4   :  { %v828_v47 = vmul.f32 %v3895_v43, %v3885_v10 }
 0x7d5   :  { %3363 = vmatmul.mubr.msk.f32.vlgmr.msra.gmra.mrb[8].mxu1 %vm394_vm4, %v623_v40 }
 0x7d6   :  { %3628 = vmatpush3.bf16.msk.msra.mxu1 %vm4338_vm8, %v3623_v39  ;;  %3376 = vmatprep.mubr.msk.f32.mxu1 %vm394_vm4, %v826_v44  ;;  %v3645_v39 = vpack.c.bf16 %v1157_v30, %v1156_v28 }
 0x7d7   :  { %3631 = vmatprep.subr.msk.bf16.mxu1 %vm4305_vm3, %v3629_v45 }
 0x7d8   :  { %3646 = vmatprep.subr.bf16.mxu0 %v3645_v39 }
 0x7d9   :  { %3377 = vmatmul.mubr.msk.f32.vlgmr.msra.gmra.mrb[10].mxu1 %vm394_vm4, %v828_v47  ;;  %3648 = vmatpush3.bf16.msra.mxu0 %v3645_v39 }
 0x7da   :  { %3383 = vmatprep.mubr.msk.f32.mxu1 %vm306_vm2, %v918_v48 }
 0x7df   :  { %3634 = vmatpush3.bf16.xpose.msk.msra.mxu1 %vm4305_vm3, %v3629_v45 }
 0x7e6   :  { %3384 = vmatmul.mubr.msk.f32.vlgmr.msra.gmra.mrb[12].mxu1 %vm306_vm2, %v920_v49 }
 0x8a8   :  { %v3364_v50 = vpop.f32.mrb[8].mxu1 }
 0x8a9   :  { %v703_v51 = vpop.f32.mrb[9].mxu1 }
 0x8ac   :  { %v3378_v52 = vpop.f32.mrb[10].mxu1 }
 0x8ad   :  { %v908_v53 = vpop.f32.mrb[11].mxu1 }
 0x8b9   :  { %v3385_v54 = vpop.f32.mrb[12].mxu1 }
 0x8ba   :  { %v1009_v55 = vmul.f32 0.35355338, %v3385_v54  ;;  %v999_v57 = vpop.f32.mrb[13].mxu1 }
 0x8bb   :  { %v1008_v59 = vmul.f32 0.35355338, %v999_v57 }
 0x8bc   :  { %v1011_v60 = vadd.f32 %v1009_v55, %v4330_v61 }
 0x8bd   :  { %v1010_v63 = vadd.f32 %v1008_v59, %v4325_v58 }
 0x8be   :  { %v1015_v0 = vsel %vm398_vm5, %v1011_v60, -inf }
 0x8bf   :  { %1016 = vmax.xlane.f32.xlu0 %v1015_v0  ;;  %v1012_v1 = vsel %vm394_vm4, %v1010_v63, -inf }
 0x8c0   :  { %1013 = vmax.xlane.f32.xlu1 %v1012_v1 }
 0x8d1   :  { %3824 = vrot.lane.b32.xlu1 %v4291_v42, %s4851_s24 }
 0x8d5   :  { %1126 = vrot.lane.b32.xlu1 %v3364_v50, %s4849_s25 }
 0x8d9   :  { %1132 = vrot.lane.b32.xlu1 %v908_v53, %s4847_s26 }
 0x8dd   :  { %1134 = vrot.lane.b32.xlu1 %v3378_v52, %s4847_s26 }
 0x94c   :  { %v1017_v2 = vpop.xlane.xlu0 %1016 }
 0x94d   :  { %v1019_v3 = vsub.f32 %v1011_v60, %v1017_v2  ;;  %v1014_v4 = vpop.xlane.xlu1 %1013 }
 0x94e   :  { %v1018_v5 = vsub.f32 %v1010_v63, %v1014_v4 }
 0x94f   :  { %v1022_v6 = vmul.f32 1.442695, %v1019_v3 }
 0x950   :  { %v1020_v7 = vmul.f32 1.442695, %v1018_v5 }
 0x951   :  { %v3825_v8 = vpop.permute.xlu1 %3824 }
 0x952   :  { %3896 = vpow2.f32 %v1020_v7  ;;  %v3827_v9 = vunpack.i.h.bf16 %v3825_v8  ;;  %v3826_v10 = vunpack.i.l.bf16 %v3825_v8  ;;  %v1286_v7 = vld [vmem:[%s4837_s6 + $0x8] sm:$0xff] }
 0x953   :  { %3898 = vpow2.f32 %v1022_v6  ;;  %v1285_v6 = vld [vmem:[%s4837_s6] sm:$0xff] }
 0x954   :  { %v3635_v42 = vpack.c.bf16 %v3827_v9, %v3826_v10  ;;  %v3649_v8 = vpack.c.bf16 %v1286_v7, %v1285_v6  ;;  %v1287_v9 = vld [vmem:[%s4837_s6 + $0x10] sm:$0xff]  ;;  %v1288_v10 = vld [vmem:[%s4837_s6 + $0x18] sm:$0xff] }
 0x955   :  { %v1127_v32 = vpop.permute.xlu1 %1126 }
 0x956   :  { %3637 = vmatprep.subr.msk.bf16.mxu1 %vm4338_vm8, %v3635_v42  ;;  %v1147_v43 = vsel %vm306_vm2, %v4362_v35, %v1127_v32  ;;  %v1431_v32 = vld [vmem:[%s4838_s7] sm:$0xff] }
 0x957   :  { %3640 = vmatpush3.bf16.msk.msra.mxu1 %vm4338_vm8, %v3635_v42  ;;  %v3653_v42 = vpack.c.bf16 %v1288_v10, %v1287_v9 }
 0x958   :  { %3650 = vmatprep.subr.bf16.mxu1 %v3649_v8 }
 0x959   :  { %v1133_v33 = vpop.permute.xlu1 %1132 }
 0x95c   :  { %v3897_v11 = vpop.eup %3896 }
 0x95d   :  { %v1024_v12 = vsel %vm394_vm4, %v3897_v11, 0.0  ;;  %v3899_v13 = vpop.eup %3898  ;;  %v1135_v37 = vpop.permute.xlu1 %1134 }
 0x95e   :  { %1025 = vadd.xlane.f32.xlu0 %v1024_v12  ;;  %v1027_v15 = vsel %vm398_vm5, %v3899_v13, 0.0  ;;  %v1150_v47 = vsel %vm1148_vm9, %v1147_v43, %v1135_v37  ;;  %v1433_v37 = vld [vmem:[%s4838_s7 + $0x10] sm:$0xff]  ;;  %v1435_v43 = vld [vmem:[%s4838_s7 + $0x20] sm:$0xff] }
 0x962   :  { %1028 = vadd.xlane.f32.xlu0 %v1027_v15 }
 0x978   :  { %1124 = vrot.lane.b32.xlu0 %v703_v51, %s4849_s25 }
 0x9eb   :  { %v1026_v16 = vpop.xlane.xlu0 %1025 }
 0x9ec   :  { %3900 = vrcp.f32 %v1026_v16 }
 0x9ef   :  { %v1029_v17 = vpop.xlane.xlu0 %1028 }
 0x9f0   :  { %3902 = vrcp.f32 %v1029_v17 }
 0x9f3   :  { %v1125_v34 = vpop.permute.xlu0 %1124 }
 0x9f4   :  { %v1146_v38 = vsel %vm306_vm2, %v4364_v36, %v1125_v34  ;;  %v1243_v36 = vsub.s32 4, %v4261_v22 }
 0x9f5   :  { %v1149_v44 = vsel %vm1148_vm9, %v1146_v38, %v1133_v33  ;;  %v1432_v33 = vld [vmem:[%s4838_s7 + $0x8] sm:$0xff]  ;;  %v1434_v38 = vld [vmem:[%s4838_s7 + $0x18] sm:$0xff] }
 0x9f6   :  { %v3901_v18 = vpop.eup %3900  ;;  %v1244_v50 = vrot.slane %v4269_v25, %v1243_v36  ;;  %v3657_v34 = vpack.c.bf16 %v1432_v33, %v1431_v32 }
 0x9f7   :  { %v1031_v19 = vmul.f32 %v3901_v18, %v3897_v11  ;;  %v1275_v18 = vsub.s32 2, %v4261_v22 }
 0x9f8   :  { %3658 = vmatprep.subr.bf16.mxu0 %v3657_v34 }
 0x9f9   :  { %3390 = vmatprep.mubr.msk.f32.mxu1 %vm394_vm4, %v1031_v19  ;;  %v1281_v19 = vsub.s32 3, %v4261_v22 }
 0x9fa   :  { %v3903_v20 = vpop.eup %3902 }
 0x9fb   :  { %v1033_v21 = vmul.f32 %v3903_v20, %v3899_v13  ;;  %v1276_v20 = vrot.slane %v4269_v25, %v1275_v18  ;;  %v1282_v27 = vrot.slane %v4269_v25, %v1281_v19 }
 0x9fd   :  { %3391 = vmatmul.mubr.msk.f32.vlgmr.msra.gmra.mrb[14].mxu1 %vm394_vm4, %v1033_v21 }
 0x9fe   :  { %3652 = vmatpush3.bf16.msra.mxu1 %v3649_v8 }
 0x9ff   :  { %3654 = vmatprep.subr.bf16.mxu1 %v3653_v42 }
 0xa02   :  { %3656 = vmatpush3.bf16.msra.mxu1 %v3653_v42 }
 0xad0   :  { %v3392_v41 = vpop.f32.mrb[14].mxu1 }
 0xad1   :  { %1142 = vrot.lane.b32.xlu1 %v3392_v41, %s4852_s27  ;;  %v1113_v31 = vpop.f32.mrb[15].mxu1 }
 0xad2   :  { %1140 = vrot.lane.b32.xlu0 %v1113_v31, %s4852_s27 }
 0xb43   :  { %v1143_v40 = vpop.permute.xlu1 %1142 }
 0xb44   :  { %v1141_v45 = vpop.permute.xlu0 %1140  ;;  %v1153_v49 = vsel %vm1151_vm10, %v1150_v47, %v1143_v40  ;;  %v3661_v40 = vpack.c.bf16 %v1434_v38, %v1433_v37  ;;  %v1437_v47 = vld [vmem:[%s4838_s7 + $0x30] sm:$0xff] }
 0xb45   :  { %v1152_v48 = vsel %vm1151_vm10, %v1149_v44, %v1141_v45  ;;  %v1436_v44 = vld [vmem:[%s4838_s7 + $0x28] sm:$0xff] }
 0xb46   :  { %3401 = vmatprep.mubr.msk.f32.mxu0 %vm167_vm0, %v1152_v48  ;;  %v3665_v45 = vpack.c.bf16 %v1436_v44, %v1435_v43  ;;  %v1438_v48 = vld [vmem:[%s4838_s7 + $0x38] sm:$0xff] }
 0xb47   :  { %3402 = vmatmul.mubr.msk.f32.vlgmr.msra.gmra.mrb[6].mxu0 %vm167_vm0, %v1153_v49  ;;  %v3669_v49 = vpack.c.bf16 %v1438_v48, %v1437_v47 }
 0xb48   :  { %3660 = vmatpush3.bf16.msra.mxu0 %v3657_v34 }
 0xb49   :  { %3662 = vmatprep.subr.bf16.mxu0 %v3661_v40 }
 0xb4c   :  { %3664 = vmatpush3.bf16.msra.mxu0 %v3661_v40 }
 0xb4d   :  { %3666 = vmatprep.subr.bf16.mxu0 %v3665_v45 }
 0xb50   :  { %3668 = vmatpush3.bf16.msra.mxu0 %v3665_v45 }
 0xb51   :  { %3670 = vmatprep.subr.bf16.mxu0 %v3669_v49 }
 0xb54   :  { %3672 = vmatpush3.bf16.msra.mxu0 %v3669_v49 }
 0xc1a   :  { %v3403_v35 = vpop.f32.mrb[6].mxu0 }
 0xc1b   :  { %v1240_v51 = vadd.f32 %v3403_v35, %v4241_v62  ;;  %v1230_v52 = vpop.f32.mrb[7].mxu0 }
 0xc1c   :  { %v1239_v53 = vadd.f32 %v1230_v52, %v4234_v56 }
 0xc1d   :  { %v4454_v54 = vadd.f32 %v1244_v50, %v1240_v51 }
 0xc1e   :  { %v4456_v55 = vadd.f32 %v1244_v50, %v1239_v53  ;;  %v3095_v50 = vld [vmem:[%s4841_s10] ss:$0 sm:$0xff] }
 0xc1f   :  { %v1250_v57 = vsel %vm171_vm1, %v4454_v54, 0.0 }
 0xc20   :  { %1251 = vadd.xlane.f32.xlu1 %v1250_v57  ;;  %v1247_v59 = vsel %vm167_vm0, %v4456_v55, 0.0 }
 0xc21   :  { %1248 = vadd.xlane.f32.xlu0 %v1247_v59 }
 0xcad   :  { %v1252_v60 = vpop.xlane.xlu1 %1251 }
 0xcae   :  { %v1254_v63 = vmul.f32 0.03125, %v1252_v60  ;;  %v1249_v0 = vpop.xlane.xlu0 %1248 }
 0xcaf   :  { %v1253_v1 = vmul.f32 0.03125, %v1249_v0 }
 0xcb0   :  { %v1256_v62 = vsub.f32 %v4454_v54, %v1254_v63 }
 0xcb1   :  { %v1255_v56 = vsub.f32 %v4456_v55, %v1253_v1 }
 0xcb2   :  { %v1258_v4 = vmul.f32 %v1256_v62, %v1256_v62 }
 0xcb3   :  { %v1257_v2 = vmul.f32 %v1255_v56, %v1255_v56 }
 0xcb4   :  { %v1262_v5 = vsel %vm171_vm1, %v1258_v4, 0.0 }
 0xcb5   :  { %v1259_v3 = vsel %vm167_vm0, %v1257_v2, 0.0 }
 0xcb6   :  { %1260 = vadd.xlane.f32.xlu0 %v1259_v3 }
 0xcba   :  { %1263 = vadd.xlane.f32.xlu0 %v1262_v5 }
 0xd43   :  { %v1261_v11 = vpop.xlane.xlu0 %1260 }
 0xd44   :  { %v1265_v12 = vmul.f32 0.03125, %v1261_v11 }
 0xd46   :  { %v1267_v13 = vadd.f32 1e-12, %v1265_v12 }
 0xd47   :  { %v1264_v15 = vpop.xlane.xlu0 %1263 }
 0xd48   :  { %3904 = vrsqrt.f32 %v1267_v13  ;;  %v1266_v16 = vmul.f32 0.03125, %v1264_v15 }
 0xd4a   :  { %v1268_v17 = vadd.f32 1e-12, %v1266_v16 }
 0xd4c   :  { %3906 = vrsqrt.f32 %v1268_v17 }
 0xd52   :  { %v3905_v21 = vpop.eup %3904 }
 0xd53   :  { %v1271_v23 = vmul.f32 %v3905_v21, %v1255_v56 }
 0xd55   :  { %v1277_v28 = vmul.f32 %v1276_v20, %v1271_v23 }
 0xd56   :  { %v3907_v29 = vpop.eup %3906 }
 0xd57   :  { %v1272_v30 = vmul.f32 %v3907_v29, %v1256_v62  ;;  %v1283_v39 = vadd.f32 %v1282_v27, %v1277_v28 }
 0xd59   :  { %v1278_v41 = vmul.f32 %v1276_v20, %v1272_v30  ;;  %3412 = vmatprep.mubr.msk.f32.mxu1 %vm167_vm0, %v1283_v39 }
 0xd5b   :  { %v1284_v31 = vadd.f32 %v1282_v27, %v1278_v41 }
 0xd5d   :  { %3413 = vmatmul.mubr.msk.f32.vlgmr.msra.gmra.mrb[16].mxu1 %vm167_vm0, %v1284_v31 }
 0xe30   :  { %v3414_v35 = vpop.f32.mrb[16].mxu1 }
 0xe31   :  { %v1374_v51 = vadd.f32 %v3414_v35, %v3095_v50  ;;  %v1368_v52 = vpop.f32.mrb[17].mxu1 }
 0xe32   :  { %v1369_v53 = vadd.f32 %v3095_v50, %v1368_v52 }
 0xe33   :  { %v1380_v57 = vmul.f32 0.70710677, %v1374_v51  ;;  %v1378_v35 = vmul.f32 0.5, %v1374_v51 }
 0xe34   :  { %v1379_v59 = vmul.f32 0.70710677, %v1369_v53  ;;  %v1377_v49 = vmul.f32 0.5, %v1369_v53 }
 0xe35   :  { %v1382_v60 = vand.u32 2147483647, %v1380_v57  ;;  %v1410_v2 = vsub.f32 0.0, %v1380_v57  ;;  %vm1422_vm11 = vcmp.ge.f32.partialorder %v1380_v57, 0.0 }
 0xe36   :  { %v1381_v63 = vand.u32 2147483647, %v1379_v59  ;;  %v1409_v3 = vsub.f32 0.0, %v1379_v59  ;;  %vm1421_vm12 = vcmp.ge.f32.partialorder %v1379_v59, 0.0 }
 0xe37   :  { %v1384_v0 = vmul.f32 0.3275911, %v1382_v60  ;;  %v1412_v5 = vmul.f32 %v1410_v2, %v1380_v57 }
 0xe38   :  { %v1383_v1 = vmul.f32 0.3275911, %v1381_v63  ;;  %v1411_v8 = vmul.f32 %v1409_v3, %v1379_v59  ;;  %v1441_v63 = vsub.s32 5, %v4261_v22 }
 0xe39   :  { %v1386_v62 = vadd.f32 1.0, %v1384_v0  ;;  %v1415_v42 = vmul.f32 1.442695, %v1412_v5 }
 0xe3a   :  { %v1385_v56 = vadd.f32 1.0, %v1383_v1  ;;  %v1413_v13 = vmul.f32 1.442695, %v1411_v8  ;;  %v1442_v57 = vrot.slane %v4269_v25, %v1441_v63 }
 0xe3b   :  { %3908 = vrcp.f32 %v1386_v62 }
 0xe3c   :  { %3910 = vrcp.f32 %v1385_v56 }
 0xe3d   :  { %3912 = vpow2.f32 %v1415_v42  ;;  %v3102_v42 = vld [vmem:[%s4835_s4 + $0x28] sm:$0xff] }
 0xe3e   :  { %3914 = vpow2.f32 %v1413_v13  ;;  %v3104_v13 = vld [vmem:[%s4835_s4 + $0x38] sm:$0xff] }
 0xe45   :  { %v3909_v4 = vpop.eup %3908 }
 0xe46   :  { %v1392_v6 = vmul.f32 1.0614054, %v3909_v4  ;;  %v3911_v7 = vpop.eup %3910 }
 0xe47   :  { %v1391_v10 = vmul.f32 1.0614054, %v3911_v7  ;;  %v3913_v31 = vpop.eup %3912 }
 0xe48   :  { %v1394_v9 = vadd.f32 -1.4531521, %v1392_v6  ;;  %v3915_v34 = vpop.eup %3914 }
 0xe49   :  { %v1393_v12 = vadd.f32 -1.4531521, %v1391_v10  ;;  %v3101_v10 = vld [vmem:[%s4835_s4 + $0x20] sm:$0xff] }
 0xe4a   :  { %v1396_v11 = vmul.f32 %v3909_v4, %v1394_v9 }
 0xe4b   :  { %v1395_v16 = vmul.f32 %v3911_v7, %v1393_v12  ;;  %v3103_v12 = vld [vmem:[%s4835_s4 + $0x30] sm:$0xff] }
 0xe4c   :  { %v1398_v15 = vadd.f32 1.4214138, %v1396_v11  ;;  %v3673_v11 = vpack.c.bf16 %v3102_v42, %v3101_v10 }
 0xe4d   :  { %v1397_v20 = vadd.f32 1.4214138, %v1395_v16 }
 0xe4e   :  { %v1400_v17 = vmul.f32 %v3909_v4, %v1398_v15  ;;  %3674 = vmatprep.subr.bf16.mxu1 %v3673_v11  ;;  %v3677_v15 = vpack.c.bf16 %v3104_v13, %v3103_v12 }
 0xe4f   :  { %v1399_v23 = vmul.f32 %v3911_v7, %v1397_v20  ;;  %3676 = vmatpush3.bf16.msra.mxu1 %v3673_v11 }
 0xe50   :  { %v1402_v21 = vadd.f32 -0.28449672, %v1400_v17  ;;  %3678 = vmatprep.subr.bf16.mxu1 %v3677_v15 }
 0xe51   :  { %v1401_v28 = vadd.f32 -0.28449672, %v1399_v23 }
 0xe52   :  { %v1404_v27 = vmul.f32 %v3909_v4, %v1402_v21 }
 0xe53   :  { %v1403_v30 = vmul.f32 %v3911_v7, %v1401_v28  ;;  %3680 = vmatpush3.bf16.msra.mxu1 %v3677_v15  ;;  %v4550_v28 = vld [vmem:[%s4839_s8 + $0x8] sm:$0x3f] }
 0xe54   :  { %v1406_v29 = vadd.f32 0.2548296, %v1404_v27 }
 0xe55   :  { %v1405_v41 = vadd.f32 0.2548296, %v1403_v30 }
 0xe56   :  { %v1408_v39 = vmul.f32 %v3909_v4, %v1406_v29  ;;  %v1558_v29 = vrot.slane %v4550_v28, %v4264_v24 }
 0xe57   :  { %v1407_v33 = vmul.f32 %v3911_v7, %v1405_v41 }
 0xe58   :  { %v1418_v32 = vmul.f32 %v3913_v31, %v1408_v39 }
 0xe59   :  { %v1417_v38 = vmul.f32 %v3915_v34, %v1407_v33 }
 0xe5a   :  { %v1420_v37 = vsub.f32 1.0, %v1418_v32  ;;  %v1564_v32 = vrot.slane %v4550_v28, %v4272_v26 }
 0xe5b   :  { %v1419_v43 = vsub.f32 1.0, %v1417_v38 }
 0xe5c   :  { %v1424_v40 = vsub.f32 0.0, %v1420_v37 }
 0xe5d   :  { %v1423_v45 = vsub.f32 0.0, %v1419_v43 }
 0xe5e   :  { %v1426_v44 = vsel %vm1422_vm11, %v1420_v37, %v1424_v40  ;;  %v3106_v40 = vld [vmem:[%s4840_s9 + $0x1] ss:$0 sm:$0xff] }
 0xe5f   :  { %v1428_v47 = vadd.f32 1.0, %v1426_v44  ;;  %v1425_v48 = vsel %vm1421_vm12, %v1419_v43, %v1423_v45 }
 0xe60   :  { %v1427_v50 = vadd.f32 1.0, %v1425_v48 }
 0xe61   :  { %v1430_v60 = vmul.f32 %v1428_v47, %v1378_v35 }
 0xe62   :  { %v1429_v52 = vmul.f32 %v1427_v50, %v1377_v49 }
 0xe64   :  { %3431 = vmatprep.mubr.msk.f32.mxu0 %vm1443_vm13, %v1429_v52 }
 0xe65   :  { %3432 = vmatmul.mubr.msk.f32.vlgmr.msra.gmra.mrb[8].mxu0 %vm1443_vm13, %v1430_v60 }
 0xf38   :  { %v3433_v0 = vpop.f32.mrb[8].mxu0 }
 0xf39   :  { %v1522_v59 = vadd.f32 %v3433_v0, %v1442_v57  ;;  %v1516_v1 = vpop.f32.mrb[9].mxu0 }
 0xf3a   :  { %v1517_v62 = vadd.f32 %v1516_v1, %v1442_v57 }
 0xf3b   :  { %v4522_v53 = vadd.f32 %v1522_v59, %v4454_v54 }
 0xf3c   :  { %v4525_v51 = vadd.f32 %v1517_v62, %v4456_v55 }
 0xf3d   :  { %v1532_v56 = vsel %vm171_vm1, %v4522_v53, 0.0 }
 0xf3e   :  { %1533 = vadd.xlane.f32.xlu1 %v1532_v56  ;;  %v1529_v2 = vsel %vm167_vm0, %v4525_v51, 0.0 }
 0xf3f   :  { %1530 = vadd.xlane.f32.xlu0 %v1529_v2 }
 0xfcb   :  { %v1534_v3 = vpop.xlane.xlu1 %1533 }
 0xfcc   :  { %v1536_v25 = vmul.f32 0.03125, %v1534_v3  ;;  %v1531_v4 = vpop.xlane.xlu0 %1530 }
 0xfcd   :  { %v1535_v5 = vmul.f32 0.03125, %v1531_v4 }
 0xfce   :  { %v1538_v6 = vsub.f32 %v4522_v53, %v1536_v25 }
 0xfcf   :  { %v1537_v54 = vsub.f32 %v4525_v51, %v1535_v5 }
 0xfd0   :  { %v1540_v7 = vmul.f32 %v1538_v6, %v1538_v6 }
 0xfd1   :  { %v1539_v8 = vmul.f32 %v1537_v54, %v1537_v54 }
 0xfd2   :  { %v1544_v55 = vsel %vm171_vm1, %v1540_v7, 0.0 }
 0xfd3   :  { %1545 = vadd.xlane.f32.xlu1 %v1544_v55  ;;  %v1541_v9 = vsel %vm167_vm0, %v1539_v8, 0.0 }
 0xfd4   :  { %1542 = vadd.xlane.f32.xlu0 %v1541_v9 }
0x1060   :  { %v1546_v16 = vpop.xlane.xlu1 %1545 }
0x1061   :  { %v1548_v17 = vmul.f32 0.03125, %v1546_v16  ;;  %v1543_v20 = vpop.xlane.xlu0 %1542 }
0x1062   :  { %v1547_v21 = vmul.f32 0.03125, %v1543_v20 }
0x1063   :  { %v1550_v23 = vadd.f32 1e-12, %v1548_v17 }
0x1064   :  { %v1549_v27 = vadd.f32 1e-12, %v1547_v21 }
0x1065   :  { %3916 = vrsqrt.f32 %v1550_v23 }
0x1066   :  { %3918 = vrsqrt.f32 %v1549_v27 }
0x106f   :  { %v3917_v30 = vpop.eup %3916 }
0x1070   :  { %v3919_v39 = vpop.eup %3918  ;;  %v1554_v41 = vmul.f32 %v3917_v30, %v1538_v6 }
0x1071   :  { %v1553_v31 = vmul.f32 %v3919_v39, %v1537_v54 }
0x1072   :  { %v1560_v33 = vmul.f32 %v1558_v29, %v1554_v41 }
0x1073   :  { %v1559_v34 = vmul.f32 %v1558_v29, %v1553_v31 }
0x1074   :  { %v1566_v38 = vadd.f32 %v1564_v32, %v1560_v33 }
0x1075   :  { %v1565_v37 = vadd.f32 %v1564_v32, %v1559_v34 }
0x1077   :  { %3442 = vmatprep.mubr.msk.f32.mxu1 %vm167_vm0, %v1565_v37 }
0x1078   :  { %3443 = vmatmul.mubr.msk.f32.vlgmr.msra.gmra.mrb[18].mxu1 %vm167_vm0, %v1566_v38 }
0x114b   :  { %v3444_v43 = vpop.f32.mrb[18].mxu1 }
0x114c   :  { %v4561_v44 = vadd.f32 %v3444_v43, %v3106_v40  ;;  %v1652_v45 = vpop.f32.mrb[19].mxu1 }
0x114d   :  { %v4563_v47 = vadd.f32 %v3106_v40, %v1652_v45 }
0x114f   :  { %3449 = vmatprep.mubr.msk.f32.mxu1 %vm306_vm2, %v4563_v47  ;;  %v4569_v48 = vpack.i.bf16 %v4561_v44, %v4563_v47 }
0x1151   :  { %3834 = vrot.lane.b32.xlu1 %v4569_v48, %s4023_s29  ;;  %3829 = vrot.lane.b32.xlu0 %v4569_v48, %s4022_s28 }
0x1155   :  { %1864 = vrot.lane.b32.xlu1 %v4563_v47, %s4024_s2 }
0x1159   :  { %1866 = vrot.lane.b32.xlu1 %v4561_v44, %s4024_s2 }
0x11c3   :  { %v3835_v49 = vpop.permute.xlu1 %3834  ;;  %v3830_v50 = vpop.permute.xlu0 %3829 }
0x11c4   :  { %v3837_v35 = vunpack.i.h.bf16 %v3835_v49  ;;  %v3836_v52 = vunpack.i.l.bf16 %v3835_v49  ;;  %v3832_v60 = vunpack.i.h.bf16 %v3830_v50  ;;  %v3831_v57 = vunpack.i.l.bf16 %v3830_v50 }
0x11c6   :  { %v3681_v0 = vpack.c.bf16 %v3832_v60, %v3831_v57  ;;  %v3693_v59 = vpack.c.bf16 %v3837_v35, %v3836_v52 }
0x11c7   :  { %v1865_v1 = vpop.permute.xlu1 %1864 }
0x11c8   :  { %3683 = vmatprep.subr.msk.bf16.mxu1 %vm4305_vm3, %v3681_v0 }
0x11c9   :  { %3686 = vmatpush3.bf16.xpose.msk.msra.mxu1 %vm4305_vm3, %v3681_v0 }
0x11ca   :  { %3695 = vmatprep.subr.msk.bf16.mxu1 %vm4305_vm3, %v3693_v59 }
0x11cb   :  { %v1867_v62 = vpop.permute.xlu1 %1866 }
0x11d0   :  { %3450 = vmatmul.mubr.msk.f32.vlgmr.msra.gmra.mrb[20].mxu1 %vm306_vm2, %v4561_v44 }
0x11d1   :  { %3698 = vmatpush3.bf16.xpose.msk.msra.mxu1 %vm4305_vm3, %v3693_v59  ;;  %3463 = vmatprep.mubr.msk.f32.mxu1 %vm306_vm2, %v1865_v1 }
0x11d8   :  { %3464 = vmatmul.mubr.msk.f32.vlgmr.msra.gmra.mrb[22].mxu1 %vm306_vm2, %v1867_v62 }
0x12a3   :  { %v3451_v56 = vpop.f32.mrb[20].mxu1 }
0x12a4   :  { %v1751_v2 = vmul.f32 0.35355338, %v3451_v56  ;;  %v1741_v3 = vpop.f32.mrb[21].mxu1 }
0x12a5   :  { %v1750_v25 = vmul.f32 0.35355338, %v1741_v3 }
0x12a6   :  { %v1753_v4 = vadd.f32 %v1751_v2, %v4330_v61 }
0x12a7   :  { %v1752_v5 = vadd.f32 %v1750_v25, %v4325_v58 }
0x12a8   :  { %v1757_v6 = vsel %vm398_vm5, %v1753_v4, -inf }
0x12a9   :  { %1758 = vmax.xlane.f32.xlu1 %v1757_v6  ;;  %v1754_v54 = vsel %vm394_vm4, %v1752_v5, -inf }
0x12aa   :  { %1755 = vmax.xlane.f32.xlu0 %v1754_v54 }
0x12ab   :  { %v3465_v7 = vpop.f32.mrb[22].mxu1 }
0x12ac   :  { %v1946_v8 = vpop.f32.mrb[23].mxu1  ;;  %v1956_v55 = vmul.f32 0.35355338, %v3465_v7 }
0x12ad   :  { %v1955_v9 = vmul.f32 0.35355338, %v1946_v8 }
0x12ae   :  { %v1958_v11 = vadd.f32 %v1956_v55, %v4330_v61 }
0x12af   :  { %v1957_v10 = vadd.f32 %v1955_v9, %v4325_v58 }
0x12b0   :  { %v1962_v12 = vsel %vm398_vm5, %v1958_v11, -inf }
0x12b1   :  { %v1959_v42 = vsel %vm394_vm4, %v1957_v10, -inf }
0x12b2   :  { %1960 = vmax.xlane.f32.xlu0 %v1959_v42 }
0x12b6   :  { %1963 = vmax.xlane.f32.xlu0 %v1962_v12 }
0x1336   :  { %v1759_v13 = vpop.xlane.xlu1 %1758 }
0x1337   :  { %v1761_v15 = vsub.f32 %v1753_v4, %v1759_v13  ;;  %v1756_v16 = vpop.xlane.xlu0 %1755 }
0x1338   :  { %v1760_v17 = vsub.f32 %v1752_v5, %v1756_v16 }
0x1339   :  { %v1764_v20 = vmul.f32 1.442695, %v1761_v15 }
0x133a   :  { %v1762_v21 = vmul.f32 1.442695, %v1760_v17 }
0x133b   :  { %3920 = vpow2.f32 %v1764_v20 }
0x133c   :  { %3922 = vpow2.f32 %v1762_v21  ;;  %v3972_v21 = vld [vmem:[%s4832_s1 + $0x8] sm:$0x3] }
0x133f   :  { %v1961_v23 = vpop.xlane.xlu0 %1960 }
0x1340   :  { %v1965_v27 = vsub.f32 %v1957_v10, %v1961_v23 }
0x1342   :  { %v1967_v29 = vmul.f32 1.442695, %v1965_v27  ;;  %v3973_v27 = vld [vmem:[%s4832_s1] sm:$0xff]  ;;  %s4858_s1 = smov 40  }
0x1343   :  { %v1964_v58 = vpop.xlane.xlu0 %1963 }
0x1344   :  { %3924 = vpow2.f32 %v1967_v29  ;;  %v1966_v30 = vsub.f32 %v1958_v11, %v1964_v58 }
0x1345   :  { %v3921_v39 = vpop.eup %3920 }
0x1346   :  { %v3923_v61 = vpop.eup %3922  ;;  %v1969_v41 = vmul.f32 1.442695, %v1966_v30  ;;  %v1769_v31 = vsel %vm398_vm5, %v3921_v39, 0.0 }
0x1347   :  { %1770 = vadd.xlane.f32.xlu1 %v1769_v31  ;;  %v1766_v32 = vsel %vm394_vm4, %v3923_v61, 0.0 }
0x1348   :  { %3926 = vpow2.f32 %v1969_v41  ;;  %1767 = vadd.xlane.f32.xlu0 %v1766_v32 }
0x134e   :  { %v3925_v33 = vpop.eup %3924 }
0x134f   :  { %v1971_v34 = vsel %vm394_vm4, %v3925_v33, 0.0 }
0x1350   :  { %1972 = vadd.xlane.f32.xlu0 %v1971_v34 }
0x1352   :  { %v3927_v37 = vpop.eup %3926 }
0x1353   :  { %v1974_v38 = vsel %vm398_vm5, %v3927_v37, 0.0 }
0x1354   :  { %1975 = vadd.xlane.f32.xlu1 %v1974_v38 }
0x1365   :  { %3844 = vrot.lane.b32.xlu1 %v4569_v48, %s4030_s21 }
0x1366   :  { %3839 = vrot.lane.b32.xlu0 %v4569_v48, %s4027_s19 }
0x1369   :  { %3849 = vrot.lane.b32.xlu1 %v4569_v48, %s4025_s30  ;;  %s4859_s30 = smov 8  }
0x136a   :  { %2071 = vrot.lane.b32.xlu0 %v4561_v44, %s4026_s16 }
0x136d   :  { %2069 = vrot.lane.b32.xlu1 %v4563_v47, %s4026_s16  ;;  %s4860_s16 = smov 16  }
0x13d4   :  { %v1771_v43 = vpop.xlane.xlu1 %1770 }
0x13d5   :  { %v1768_v40 = vpop.xlane.xlu0 %1767 }
0x13d6   :  { %3928 = vrcp.f32 %v1768_v40 }
0x13d7   :  { %3930 = vrcp.f32 %v1771_v43 }
0x13dd   :  { %v1973_v45 = vpop.xlane.xlu0 %1972 }
0x13de   :  { %3932 = vrcp.f32 %v1973_v45 }
0x13e0   :  { %v3929_v49 = vpop.eup %3928 }
0x13e1   :  { %v1976_v50 = vpop.xlane.xlu1 %1975  ;;  %v3840_v35 = vpop.permute.xlu0 %3839  ;;  %v1773_v52 = vmul.f32 %v3929_v49, %v3923_v61 }
0x13e2   :  { %3934 = vrcp.f32 %v1976_v50  ;;  %v3842_v60 = vunpack.i.h.bf16 %v3840_v35  ;;  %v3841_v57 = vunpack.i.l.bf16 %v3840_v35  ;;  %v3931_v59 = vpop.eup %3930 }
0x13e3   :  { %3456 = vmatprep.mubr.msk.f32.mxu0 %vm394_vm4, %v1773_v52  ;;  %v1775_v3 = vmul.f32 %v3931_v59, %v3921_v39 }
0x13e4   :  { %v3687_v0 = vpack.c.bf16 %v3842_v60, %v3841_v57 }
0x13e5   :  { %v3845_v1 = vpop.permute.xlu1 %3844  ;;  %v2072_v10 = vpop.permute.xlu0 %2071 }
0x13e6   :  { %v3847_v62 = vunpack.i.h.bf16 %v3845_v1  ;;  %v3846_v56 = vunpack.i.l.bf16 %v3845_v1  ;;  %3689 = vmatprep.subr.msk.bf16.mxu0 %vm4338_vm8, %v3687_v0 }
0x13e7   :  { %3692 = vmatpush3.bf16.msk.msra.mxu0 %vm4338_vm8, %v3687_v0 }
0x13e8   :  { %v3933_v2 = vpop.eup %3932  ;;  %v3699_v25 = vpack.c.bf16 %v3847_v62, %v3846_v56 }
0x13e9   :  { %v3850_v4 = vpop.permute.xlu1 %3849  ;;  %v1978_v5 = vmul.f32 %v3933_v2, %v3925_v33 }
0x13ea   :  { %v3852_v6 = vunpack.i.h.bf16 %v3850_v4  ;;  %v3851_v54 = vunpack.i.l.bf16 %v3850_v4  ;;  %3457 = vmatmul.mubr.msk.f32.vlgmr.msra.gmra.mrb[10].mxu0 %vm394_vm4, %v1775_v3  ;;  %3701 = vmatprep.subr.msk.bf16.mxu0 %vm4338_vm8, %v3699_v25 }
0x13eb   :  { %3704 = vmatpush3.bf16.msk.msra.mxu0 %vm4338_vm8, %v3699_v25  ;;  %3470 = vmatprep.mubr.msk.f32.mxu0 %vm394_vm4, %v1978_v5 }
0x13ec   :  { %v3935_v7 = vpop.eup %3934  ;;  %v3705_v8 = vpack.c.bf16 %v3852_v6, %v3851_v54 }
0x13ed   :  { %v1980_v55 = vmul.f32 %v3935_v7, %v3927_v37  ;;  %v2070_v9 = vpop.permute.xlu1 %2069 }
0x13ee   :  { %3707 = vmatprep.subr.msk.bf16.mxu0 %vm4305_vm3, %v3705_v8 }
0x13ef   :  { %3471 = vmatmul.mubr.msk.f32.vlgmr.msra.gmra.mrb[12].mxu0 %vm394_vm4, %v1980_v55 }
0x13f0   :  { %3477 = vmatprep.mubr.msk.f32.mxu0 %vm306_vm2, %v2070_v9 }
0x13f4   :  { %3710 = vmatpush3.bf16.xpose.msk.msra.mxu0 %vm4305_vm3, %v3705_v8 }
0x13fb   :  { %3478 = vmatmul.mubr.msk.f32.vlgmr.msra.gmra.mrb[14].mxu0 %vm306_vm2, %v2072_v10 }
0x14bd   :  { %v4631_v42 = vpop.f32.mrb[10].mxu0 }
0x14be   :  { %v4633_v11 = vpop.f32.mrb[11].mxu0 }
0x14c2   :  { %v4635_v12 = vpop.f32.mrb[12].mxu0 }
0x14c3   :  { %v4637_v13 = vpop.f32.mrb[13].mxu0 }
0x14ce   :  { %v3479_v15 = vpop.f32.mrb[14].mxu0 }
0x14cf   :  { %v2161_v16 = vmul.f32 0.35355338, %v3479_v15  ;;  %v2151_v17 = vpop.f32.mrb[15].mxu0 }
0x14d0   :  { %v2160_v20 = vmul.f32 0.35355338, %v2151_v17 }
0x14d1   :  { %v2163_v23 = vadd.f32 %v3972_v21, %v2161_v16 }
0x14d2   :  { %v2162_v29 = vadd.f32 %v3973_v27, %v2160_v20 }
0x14d3   :  { %v2167_v58 = vsel %vm398_vm5, %v2163_v23, -inf }
0x14d4   :  { %2168 = vmax.xlane.f32.xlu0 %v2167_v58  ;;  %v2164_v30 = vsel %vm394_vm4, %v2162_v29, -inf }
0x14d5   :  { %2165 = vmax.xlane.f32.xlu1 %v2164_v30 }
0x14e6   :  { %3854 = vrot.lane.b32.xlu1 %v4569_v48, %s4029_s20 }
0x14ea   :  { %2274 = vrot.lane.b32.xlu1 %v4563_v47, %s4032_s23 }
0x14ee   :  { %2276 = vrot.lane.b32.xlu1 %v4561_v44, %s4032_s23 }
0x1561   :  { %v2169_v39 = vpop.xlane.xlu0 %2168 }
0x1562   :  { %v2171_v61 = vsub.f32 %v2163_v23, %v2169_v39  ;;  %v2166_v41 = vpop.xlane.xlu1 %2165 }
0x1563   :  { %v2170_v31 = vsub.f32 %v2162_v29, %v2166_v41 }
0x1564   :  { %v2174_v32 = vmul.f32 1.442695, %v2171_v61 }
0x1565   :  { %v2172_v33 = vmul.f32 1.442695, %v2170_v31 }
0x1566   :  { %3936 = vpow2.f32 %v2174_v32  ;;  %v3855_v34 = vpop.permute.xlu1 %3854 }
0x1567   :  { %v3857_v37 = vunpack.i.h.bf16 %v3855_v34  ;;  %v3856_v38 = vunpack.i.l.bf16 %v3855_v34  ;;  %3938 = vpow2.f32 %v2172_v33  ;;  %v3137_v33 = vld [vmem:[%s4836_s5 + $0x20] sm:$0xff]  ;;  %v3139_v34 = vld [vmem:[%s4836_s5 + $0x30] sm:$0xff] }
0x1569   :  { %v3711_v40 = vpack.c.bf16 %v3857_v37, %v3856_v38  ;;  %v3140_v38 = vld [vmem:[%s4836_s5 + $0x38] sm:$0xff] }
0x156a   :  { %v2275_v56 = vpop.permute.xlu1 %2274 }
0x156b   :  { %3713 = vmatprep.subr.msk.bf16.mxu1 %vm4338_vm8, %v3711_v40 }
0x156c   :  { %3716 = vmatpush3.bf16.msk.msra.mxu1 %vm4338_vm8, %v3711_v40  ;;  %v3733_v40 = vpack.c.bf16 %v3140_v38, %v3139_v34  ;;  %v3152_v38 = vld [vmem:[%s4838_s7 + $0x48] sm:$0xff] }
0x156e   :  { %v2277_v2 = vpop.permute.xlu1 %2276 }
0x1570   :  { %v3937_v47 = vpop.eup %3936 }
0x1571   :  { %v2179_v44 = vsel %vm398_vm5, %v3937_v47, 0.0  ;;  %v3939_v43 = vpop.eup %3938 }
0x1572   :  { %2180 = vadd.xlane.f32.xlu0 %v2179_v44  ;;  %v2176_v45 = vsel %vm394_vm4, %v3939_v43, 0.0 }
0x1576   :  { %2177 = vadd.xlane.f32.xlu0 %v2176_v45 }
0x158c   :  { %3859 = vrot.lane.b32.xlu0 %v4569_v48, %s4031_s22 }
0x15ff   :  { %v2181_v49 = vpop.xlane.xlu0 %2180 }
0x1600   :  { %3940 = vrcp.f32 %v2181_v49 }
0x1603   :  { %v2178_v50 = vpop.xlane.xlu0 %2177 }
0x1604   :  { %3942 = vrcp.f32 %v2178_v50 }
0x1607   :  { %v3860_v35 = vpop.permute.xlu0 %3859 }
0x1608   :  { %v3862_v52 = vunpack.i.h.bf16 %v3860_v35  ;;  %v3861_v60 = vunpack.i.l.bf16 %v3860_v35 }
0x160a   :  { %v3717_v57 = vpack.c.bf16 %v3862_v52, %v3861_v60  ;;  %v3941_v0 = vpop.eup %3940 }
0x160b   :  { %v2185_v62 = vmul.f32 %v3941_v0, %v3937_v47 }
0x160c   :  { %3719 = vmatprep.subr.msk.bf16.mxu1 %vm4305_vm3, %v3717_v57 }
0x160e   :  { %v3943_v59 = vpop.eup %3942 }
0x160f   :  { %v2183_v1 = vmul.f32 %v3943_v59, %v3939_v43 }
0x1611   :  { %3484 = vmatprep.mubr.msk.f32.mxu1 %vm394_vm4, %v2183_v1 }
0x1612   :  { %3485 = vmatmul.mubr.msk.f32.vlgmr.msra.gmra.mrb[24].mxu1 %vm394_vm4, %v2185_v62 }
0x1613   :  { %3722 = vmatpush3.bf16.xpose.msk.msra.mxu1 %vm4305_vm3, %v3717_v57  ;;  %3491 = vmatprep.mubr.msk.f32.mxu1 %vm306_vm2, %v2275_v56  ;;  %vm3015_vm3 = vcmask 25600  }
0x161a   :  { %3492 = vmatmul.mubr.msk.f32.vlgmr.msra.gmra.mrb[26].mxu1 %vm306_vm2, %v2277_v2 }
0x16e5   :  { %v3486_v3 = vpop.f32.mrb[24].mxu1 }
0x16e6   :  { %v2265_v25 = vpop.f32.mrb[25].mxu1 }
0x16ed   :  { %v3493_v4 = vpop.f32.mrb[26].mxu1 }
0x16ee   :  { %v2366_v5 = vmul.f32 0.35355338, %v3493_v4  ;;  %v2356_v6 = vpop.f32.mrb[27].mxu1 }
0x16ef   :  { %v2365_v54 = vmul.f32 0.35355338, %v2356_v6 }
0x16f0   :  { %v2368_v7 = vadd.f32 %v3972_v21, %v2366_v5 }
0x16f1   :  { %v2367_v8 = vadd.f32 %v3973_v27, %v2365_v54 }
0x16f2   :  { %v2372_v55 = vsel %vm398_vm5, %v2368_v7, -inf }
0x16f3   :  { %2373 = vmax.xlane.f32.xlu0 %v2372_v55  ;;  %v2369_v9 = vsel %vm394_vm4, %v2367_v8, -inf }
0x16f4   :  { %2370 = vmax.xlane.f32.xlu1 %v2369_v9 }
0x1705   :  { %3864 = vrot.lane.b32.xlu1 %v4569_v48, %s4858_s1 }
0x1709   :  { %2483 = vrot.lane.b32.xlu1 %v4635_v12, %s4859_s30 }
0x170d   :  { %2489 = vrot.lane.b32.xlu1 %v2265_v25, %s4860_s16 }
0x1711   :  { %2491 = vrot.lane.b32.xlu1 %v3486_v3, %s4860_s16 }
0x1780   :  { %v2374_v46 = vpop.xlane.xlu0 %2373 }
0x1781   :  { %v2376_v10 = vsub.f32 %v2368_v7, %v2374_v46  ;;  %v2371_v15 = vpop.xlane.xlu1 %2370 }
0x1782   :  { %v2375_v16 = vsub.f32 %v2367_v8, %v2371_v15  ;;  %v3143_v15 = vld [vmem:[%s4837_s6 + $0x20] sm:$0xff] }
0x1783   :  { %v2379_v17 = vmul.f32 1.442695, %v2376_v10 }
0x1784   :  { %v2377_v20 = vmul.f32 1.442695, %v2375_v16  ;;  %v3144_v16 = vld [vmem:[%s4837_s6 + $0x28] sm:$0xff] }
0x1785   :  { %v3865_v21 = vpop.permute.xlu1 %3864 }
0x1786   :  { %3944 = vpow2.f32 %v2377_v20  ;;  %v3867_v23 = vunpack.i.h.bf16 %v3865_v21  ;;  %v3866_v27 = vunpack.i.l.bf16 %v3865_v21  ;;  %v3145_v20 = vld [vmem:[%s4837_s6 + $0x30] sm:$0xff]  ;;  %v3146_v21 = vld [vmem:[%s4837_s6 + $0x38] sm:$0xff] }
0x1787   :  { %3946 = vpow2.f32 %v2379_v17  ;;  %v3737_v17 = vpack.c.bf16 %v3144_v16, %v3143_v15 }
0x1788   :  { %v3723_v29 = vpack.c.bf16 %v3867_v23, %v3866_v27  ;;  %v3741_v23 = vpack.c.bf16 %v3146_v21, %v3145_v20 }
0x1789   :  { %v2484_v43 = vpop.permute.xlu1 %2483  ;;  %3738 = vmatprep.subr.bf16.mxu1 %v3737_v17 }
0x178a   :  { %3725 = vmatprep.subr.msk.bf16.mxu0 %vm4338_vm8, %v3723_v29  ;;  %v2504_v60 = vsel %vm306_vm2, %v4631_v42, %v2484_v43  ;;  %3740 = vmatpush3.bf16.msra.mxu1 %v3737_v17  ;;  %v3155_v43 = vld [vmem:[%s4838_s7 + $0x60] sm:$0xff] }
0x178b   :  { %3728 = vmatpush3.bf16.msk.msra.mxu0 %vm4338_vm8, %v3723_v29  ;;  %3742 = vmatprep.subr.bf16.mxu1 %v3741_v23 }
0x178d   :  { %v2490_v45 = vpop.permute.xlu1 %2489 }
0x178e   :  { %3744 = vmatpush3.bf16.msra.mxu1 %v3741_v23 }
0x1790   :  { %v3945_v48 = vpop.eup %3944 }
0x1791   :  { %v2381_v12 = vsel %vm394_vm4, %v3945_v48, 0.0  ;;  %v3947_v58 = vpop.eup %3946  ;;  %v2492_v50 = vpop.permute.xlu1 %2491 }
0x1792   :  { %2382 = vadd.xlane.f32.xlu0 %v2381_v12  ;;  %v2384_v30 = vsel %vm398_vm5, %v3947_v58, 0.0  ;;  %v2506_v59 = vsel %vm1148_vm9, %v2504_v60, %v2492_v50  ;;  %v3157_v50 = vld [vmem:[%s4838_s7 + $0x70] sm:$0xff]  ;;  %v3148_v60 = vld [vmem:[%s4841_s10 + $0x1] ss:$0 sm:$0xff] }
0x1796   :  { %2385 = vadd.xlane.f32.xlu0 %v2384_v30 }
0x17ac   :  { %2481 = vrot.lane.b32.xlu0 %v4637_v13, %s4859_s30  ;;  %v3138_v13 = vld [vmem:[%s4836_s5 + $0x28] sm:$0xff] }
0x17ad   :  { %v3729_v37 = vpack.c.bf16 %v3138_v13, %v3137_v33 }
0x17af   :  { %3730 = vmatprep.subr.bf16.mxu0 %v3729_v37 }
0x181f   :  { %v2383_v39 = vpop.xlane.xlu0 %2382 }
0x1820   :  { %3948 = vrcp.f32 %v2383_v39  ;;  %v2632_v39 = vrot.slane %v4550_v28, %v1275_v18  ;;  %v3151_v18 = vld [vmem:[%s4838_s7 + $0x40] sm:$0xff] }
0x1823   :  { %v2386_v61 = vpop.xlane.xlu0 %2385 }
0x1824   :  { %3950 = vrcp.f32 %v2386_v61 }
0x1827   :  { %v2482_v49 = vpop.permute.xlu0 %2481 }
0x1828   :  { %v2503_v35 = vsel %vm306_vm2, %v4633_v11, %v2482_v49  ;;  %v2600_v11 = vrot.slane %v4550_v28, %v1243_v36  ;;  %vm2886_vm2 = vcmask 1040384  }
0x1829   :  { %v2505_v57 = vsel %vm1148_vm9, %v2503_v35, %v2490_v45  ;;  %v3156_v45 = vld [vmem:[%s4838_s7 + $0x68] sm:$0xff]  ;;  %v3158_v35 = vld [vmem:[%s4838_s7 + $0x78] sm:$0xff] }
0x182a   :  { %v3949_v41 = vpop.eup %3948  ;;  %v3753_v49 = vpack.c.bf16 %v3156_v45, %v3155_v43 }
0x182b   :  { %v2388_v31 = vmul.f32 %v3949_v41, %v3945_v48 }
0x182d   :  { %3498 = vmatprep.mubr.msk.f32.mxu0 %vm394_vm4, %v2388_v31  ;;  %v2638_v31 = vrot.slane %v4550_v28, %v1281_v19  ;;  %v3153_v19 = vld [vmem:[%s4838_s7 + $0x50] sm:$0xff] }
0x182e   :  { %v3951_v14 = vpop.eup %3950 }
0x182f   :  { %v2390_v32 = vmul.f32 %v3951_v14, %v3947_v58 }
0x1831   :  { %3499 = vmatmul.mubr.msk.f32.vlgmr.msra.gmra.mrb[16].mxu0 %vm394_vm4, %v2390_v32 }
0x1832   :  { %3732 = vmatpush3.bf16.msra.mxu0 %v3729_v37 }
0x1833   :  { %3734 = vmatprep.subr.bf16.mxu0 %v3733_v40 }
0x1836   :  { %3736 = vmatpush3.bf16.msra.mxu0 %v3733_v40  ;;  %v3745_v40 = vpack.c.bf16 %v3152_v38, %v3151_v18 }
0x1838   :  { %3746 = vmatprep.subr.bf16.mxu0 %v3745_v40 }
0x1904   :  { %v3500_v47 = vpop.f32.mrb[16].mxu0 }
0x1905   :  { %2499 = vrot.lane.b32.xlu1 %v3500_v47, %s4861_s18  ;;  %v2470_v44 = vpop.f32.mrb[17].mxu0  ;;  %v3154_v47 = vld [vmem:[%s4838_s7 + $0x58] sm:$0xff] }
0x1906   :  { %2497 = vrot.lane.b32.xlu0 %v2470_v44, %s4861_s18  ;;  %v3749_v44 = vpack.c.bf16 %v3154_v47, %v3153_v19 }
0x1977   :  { %v2500_v52 = vpop.permute.xlu1 %2499 }
0x1978   :  { %v2498_v0 = vpop.permute.xlu0 %2497  ;;  %v2508_v62 = vsel %vm1151_vm10, %v2506_v59, %v2500_v52  ;;  %v3757_v52 = vpack.c.bf16 %v3158_v35, %v3157_v50  ;;  %v2801_v50 = vrot.slane %v4550_v28, %v1441_v63 }
0x1979   :  { %v2507_v1 = vsel %vm1151_vm10, %v2505_v57, %v2498_v0 }
0x197a   :  { %3509 = vmatprep.mubr.msk.f32.mxu0 %vm167_vm0, %v2507_v1 }
0x197b   :  { %3510 = vmatmul.mubr.msk.f32.vlgmr.msra.gmra.mrb[18].mxu0 %vm167_vm0, %v2508_v62 }
0x197c   :  { %3748 = vmatpush3.bf16.msra.mxu0 %v3745_v40 }
0x197d   :  { %3750 = vmatprep.subr.bf16.mxu0 %v3749_v44 }
0x1980   :  { %3752 = vmatpush3.bf16.msra.mxu0 %v3749_v44 }
0x1981   :  { %3754 = vmatprep.subr.bf16.mxu0 %v3753_v49 }
0x1984   :  { %3756 = vmatpush3.bf16.msra.mxu0 %v3753_v49 }
0x1985   :  { %3758 = vmatprep.subr.bf16.mxu0 %v3757_v52 }
0x1988   :  { %3760 = vmatpush3.bf16.msra.mxu0 %v3757_v52 }
0x1a4e   :  { %v3511_v56 = vpop.f32.mrb[18].mxu0 }
0x1a4f   :  { %v2596_v42 = vadd.f32 %v3511_v56, %v4522_v53  ;;  %v2586_v2 = vpop.f32.mrb[19].mxu0 }
0x1a50   :  { %v2595_v3 = vadd.f32 %v2586_v2, %v4525_v51 }
0x1a51   :  { %v2602_v25 = vadd.f32 %v2600_v11, %v2596_v42 }
0x1a52   :  { %v4716_v4 = vadd.f32 %v2600_v11, %v2595_v3 }
0x1a53   :  { %v2606_v5 = vsel %vm171_vm1, %v2602_v25, 0.0 }
0x1a54   :  { %2607 = vadd.xlane.f32.xlu1 %v2606_v5  ;;  %v2603_v6 = vsel %vm167_vm0, %v4716_v4, 0.0 }
0x1a55   :  { %2604 = vadd.xlane.f32.xlu0 %v2603_v6 }
0x1ae1   :  { %v2608_v54 = vpop.xlane.xlu1 %2607 }
0x1ae2   :  { %v2610_v7 = vmul.f32 0.03125, %v2608_v54  ;;  %v2605_v8 = vpop.xlane.xlu0 %2604 }
0x1ae3   :  { %v2609_v36 = vmul.f32 0.03125, %v2605_v8 }
0x1ae4   :  { %v2612_v55 = vsub.f32 %v2602_v25, %v2610_v7 }
0x1ae5   :  { %v2611_v53 = vsub.f32 %v4716_v4, %v2609_v36 }
0x1ae6   :  { %v2614_v46 = vmul.f32 %v2612_v55, %v2612_v55 }
0x1ae7   :  { %v2613_v9 = vmul.f32 %v2611_v53, %v2611_v53 }
0x1ae8   :  { %v2618_v10 = vsel %vm171_vm1, %v2614_v46, 0.0 }
0x1ae9   :  { %v2615_v51 = vsel %vm167_vm0, %v2613_v9, 0.0 }
0x1aea   :  { %2616 = vadd.xlane.f32.xlu0 %v2615_v51 }
0x1aee   :  { %2619 = vadd.xlane.f32.xlu0 %v2618_v10 }
0x1b77   :  { %v2617_v27 = vpop.xlane.xlu0 %2616 }
0x1b78   :  { %v2621_v29 = vmul.f32 0.03125, %v2617_v27 }
0x1b7a   :  { %v2623_v48 = vadd.f32 1e-12, %v2621_v29 }
0x1b7b   :  { %v2620_v12 = vpop.xlane.xlu0 %2619 }
0x1b7c   :  { %3952 = vrsqrt.f32 %v2623_v48  ;;  %v2622_v58 = vmul.f32 0.03125, %v2620_v12 }
0x1b7e   :  { %v2624_v30 = vadd.f32 1e-12, %v2622_v58 }
0x1b80   :  { %3954 = vrsqrt.f32 %v2624_v30 }
0x1b86   :  { %v3953_v61 = vpop.eup %3952 }
0x1b87   :  { %v2627_v41 = vmul.f32 %v3953_v61, %v2611_v53 }
0x1b89   :  { %v2633_v14 = vmul.f32 %v2632_v39, %v2627_v41 }
0x1b8a   :  { %v3955_v32 = vpop.eup %3954 }
0x1b8b   :  { %v2628_v33 = vmul.f32 %v3955_v32, %v2612_v55  ;;  %v2639_v13 = vadd.f32 %v2638_v31, %v2633_v14 }
0x1b8d   :  { %v2634_v34 = vmul.f32 %v2632_v39, %v2628_v33  ;;  %3520 = vmatprep.mubr.msk.f32.mxu1 %vm167_vm0, %v2639_v13 }
0x1b8f   :  { %v2640_v37 = vadd.f32 %v2638_v31, %v2634_v34 }
0x1b91   :  { %3521 = vmatmul.mubr.msk.f32.vlgmr.msra.gmra.mrb[28].mxu1 %vm167_vm0, %v2640_v37 }
0x1c64   :  { %v3522_v57 = vpop.f32.mrb[28].mxu1 }
0x1c65   :  { %v2732_v0 = vadd.f32 %v3522_v57, %v3148_v60  ;;  %v2726_v59 = vpop.f32.mrb[29].mxu1 }
0x1c66   :  { %v2727_v1 = vadd.f32 %v3148_v60, %v2726_v59 }
0x1c67   :  { %v2738_v62 = vmul.f32 0.70710677, %v2732_v0  ;;  %v2736_v43 = vmul.f32 0.5, %v2732_v0 }
0x1c68   :  { %v2737_v11 = vmul.f32 0.70710677, %v2727_v1  ;;  %v2735_v47 = vmul.f32 0.5, %v2727_v1 }
0x1c69   :  { %v2740_v56 = vand.u32 2147483647, %v2738_v62  ;;  %v2768_v6 = vsub.f32 0.0, %v2738_v62  ;;  %vm2780_vm14 = vcmp.ge.f32.partialorder %v2738_v62, 0.0 }
0x1c6a   :  { %v2739_v42 = vand.u32 2147483647, %v2737_v11  ;;  %v2767_v54 = vsub.f32 0.0, %v2737_v11  ;;  %vm2779_vm15 = vcmp.ge.f32.partialorder %v2737_v11, 0.0 }
0x1c6b   :  { %v2742_v2 = vmul.f32 0.3275911, %v2740_v56  ;;  %v2770_v8 = vmul.f32 %v2768_v6, %v2738_v62 }
0x1c6c   :  { %v2741_v3 = vmul.f32 0.3275911, %v2739_v42  ;;  %v2769_v53 = vmul.f32 %v2767_v54, %v2737_v11 }
0x1c6d   :  { %v2744_v25 = vadd.f32 1.0, %v2742_v2  ;;  %v2773_v46 = vmul.f32 1.442695, %v2770_v8 }
0x1c6e   :  { %v2743_v5 = vadd.f32 1.0, %v2741_v3  ;;  %v2771_v16 = vmul.f32 1.442695, %v2769_v53 }
0x1c6f   :  { %3956 = vrcp.f32 %v2744_v25 }
0x1c70   :  { %3958 = vrcp.f32 %v2743_v5 }
0x1c71   :  { %3960 = vpow2.f32 %v2773_v46  ;;  %v2927_v46 = vld [vmem:[%s4843_s12 + $0x10] sm:$0xff] }
0x1c72   :  { %3962 = vpow2.f32 %v2771_v16  ;;  %v2928_v16 = vld [vmem:[%s4843_s12 + $0x18] sm:$0xff] }
0x1c79   :  { %v3957_v7 = vpop.eup %3956 }
0x1c7a   :  { %v2750_v36 = vmul.f32 1.0614054, %v3957_v7  ;;  %v3959_v55 = vpop.eup %3958 }
0x1c7b   :  { %v2749_v51 = vmul.f32 1.0614054, %v3959_v55  ;;  %v3961_v41 = vpop.eup %3960 }
0x1c7c   :  { %v2752_v9 = vadd.f32 -1.4531521, %v2750_v36  ;;  %v3963_v32 = vpop.eup %3962 }
0x1c7d   :  { %v2751_v15 = vadd.f32 -1.4531521, %v2749_v51 }
0x1c7e   :  { %v2754_v10 = vmul.f32 %v3957_v7, %v2752_v9 }
0x1c7f   :  { %v2753_v20 = vmul.f32 %v3959_v55, %v2751_v15 }
0x1c80   :  { %v2756_v17 = vadd.f32 1.4214138, %v2754_v10  ;;  %v4037_v10 = vmov 0.0|0.0  }
0x1c81   :  { %v2755_v23 = vadd.f32 1.4214138, %v2753_v20  ;;  %3761 = vmatprep.subr.bf16.mxu1 %v4037_v10  ;;  %v3765_v20 = vpack.c.bf16 %v2928_v16, %v2927_v46 }
0x1c82   :  { %v2758_v21 = vmul.f32 %v3957_v7, %v2756_v17  ;;  %v4039_v17 = vmov 0.0  }
0x1c83   :  { %v2757_v29 = vmul.f32 %v3959_v55, %v2755_v23 }
0x1c84   :  { %v2760_v27 = vadd.f32 -0.28449672, %v2758_v21 }
0x1c85   :  { %v2759_v12 = vadd.f32 -0.28449672, %v2757_v29 }
0x1c86   :  { %v2762_v48 = vmul.f32 %v3957_v7, %v2760_v27 }
0x1c87   :  { %v2761_v30 = vmul.f32 %v3959_v55, %v2759_v12  ;;  %v3161_v12 = vld [vmem:[%s4844_s13] ss:$0 sm:$0xff]  ;;  %s4041_s13 = smov [#allocation2]  }
0x1c88   :  { %v2764_v58 = vadd.f32 0.2548296, %v2762_v48  ;;  %s3040_s2 = sshll.u32 %s4041_s13, 4  ;;  %s3041_s2 = int_to_ptr.vmem [resolvable:$true] %s3040_s2 }
0x1c89   :  { %v2763_v61 = vadd.f32 0.2548296, %v2761_v30  ;;  %s3974_s1 = scalar_lea.vmem %s3041_s2, 32  ;;  %p3979_p1 = scmp.lt.s32.totalorder %s3041_s2, %s3041_s2 }
0x1c8a   :  { %v2766_v39 = vmul.f32 %v3957_v7, %v2764_v58  ;;  %p3975_p0 = scmp.ne.s32.totalorder %s3041_s2, %s3974_s1  ;;  %p3980_p2 = scmp.lt.s32.totalorder %s3974_s1, %s3974_s1 }
0x1c8b   :  { %v2765_v14 = vmul.f32 %v3959_v55, %v2763_v61 }
0x1c8c   :  { %v2776_v31 = vmul.f32 %v3961_v41, %v2766_v39  ;;  %p3981_p3 = por %p3980_p2, %p3979_p1 }
0x1c8d   :  { %v2775_v13 = vmul.f32 %v3963_v32, %v2765_v14 }
0x1c8e   :  { %v2778_v33 = vsub.f32 1.0, %v2776_v31  ;;  %p3982_p4 = pnand %p3981_p3, %p3975_p0 }
0x1c8f   :  { %v2777_v37 = vsub.f32 1.0, %v2775_v13 }
0x1c90   :  { %v2782_v34 = vsub.f32 0.0, %v2778_v33 }
0x1c91   :  { %v2781_v38 = vsub.f32 0.0, %v2777_v37 }
0x1c92   :  { %v2784_v18 = vsel %vm2780_vm14, %v2778_v33, %v2782_v34 }
0x1c93   :  { %v2786_v40 = vadd.f32 1.0, %v2784_v18  ;;  %v2783_v19 = vsel %vm2779_vm15, %v2777_v37, %v2781_v38 }
0x1c94   :  { %v2785_v44 = vadd.f32 1.0, %v2783_v19 }
0x1c95   :  { %v2788_v49 = vmul.f32 %v2786_v40, %v2736_v43 }
0x1c96   :  { %v2787_v45 = vmul.f32 %v2785_v44, %v2735_v47 }
0x1c98   :  { %3539 = vmatprep.mubr.msk.f32.mxu0 %vm1443_vm13, %v2787_v45 }
0x1c99   :  { %3540 = vmatmul.mubr.msk.f32.vlgmr.msra.gmra.mrb[20].mxu0 %vm1443_vm13, %v2788_v49 }
0x1d6c   :  { %v3541_v35 = vpop.f32.mrb[20].mxu0 }
0x1d6d   :  { %v2874_v52 = vpop.f32.mrb[21].mxu0 }
0x1d6e   :  { %v2875_v60 = vadd.f32 %v2874_v52, %v2801_v50 }
0x1d70   :  { %v2882_v57 = vadd.f32 %v2875_v60, %v4716_v4  ;;  %v2888_v4 = vld [vmem:[%s4842_s11] sm:$0x3] }
0x1d71   :  { %v2905_v3 = vrot.slane %v2888_v4, %v4264_v24  ;;  %v2910_v6 = vrot.slane %v2888_v4, %v4272_v26  ;;  %v2925_v24 = vld [vmem:[%s4843_s12] sm:$0xff]  ;;  %v2926_v26 = vld [vmem:[%s4843_s12 + $0x8] sm:$0xff]  ;;  %s4040_s12 = smov 118  }
0x1d72   :  { %v2884_v59 = vrot.slane %v2882_v57, 4  ;;  %v3762_v15 = vpack.c.bf16 %v2926_v26, %v2925_v24 }
0x1d74   :  { %v2887_v1 = vsel %vm2886_vm2, %v2882_v57, %v2884_v59  ;;  %3763 = vmatpush3.bf16.msra.mxu1 %v3762_v15 }
0x1d75   :  { %v2889_v0 = vsel %vm171_vm1, %v2887_v1, 0.0  ;;  %3764 = vmatprep.subr.bf16.mxu1 %v4037_v10 }
0x1d76   :  { %2890 = vadd.xlane.f32.xlu0 %v2889_v0 }
0x1d78   :  { %3766 = vmatpush3.bf16.msra.mxu1 %v3765_v20 }
0x1e03   :  { %v2891_v62 = vpop.xlane.xlu0 %2890 }
0x1e04   :  { %v2892_v11 = vmul.f32 0.03125, %v2891_v62 }
0x1e06   :  { %v2893_v56 = vsub.f32 %v2887_v1, %v2892_v11 }
0x1e08   :  { %v2894_v42 = vmul.f32 %v2893_v56, %v2893_v56 }
0x1e0a   :  { %v2895_v2 = vsel %vm171_vm1, %v2894_v42, 0.0 }
0x1e0b   :  { %2896 = vadd.xlane.f32.xlu1 %v2895_v2 }
0x1e98   :  { %v2897_v22 = vpop.xlane.xlu1 %2896 }
0x1e99   :  { %v2898_v63 = vmul.f32 0.03125, %v2897_v22 }
0x1e9b   :  { %v2899_v28 = vadd.f32 1e-12, %v2898_v63 }
0x1e9d   :  { %3964 = vrsqrt.f32 %v2899_v28 }
0x1ea7   :  { %v3965_v25 = vpop.eup %3964 }
0x1ea8   :  { %v2901_v5 = vmul.f32 %v3965_v25, %v2893_v56 }
0x1eaa   :  { %v2906_v54 = vmul.f32 %v2905_v3, %v2901_v5 }
0x1eac   :  { %v2911_v7 = vadd.f32 %v2910_v6, %v2906_v54 }
0x1eae   :  { %v2912_v8 = vsel %vm171_vm1, %v2911_v7, 0.0 }
0x1eaf   :  { %2913 = vadd.xlane.f32.xlu0 %v2912_v8 }
0x1f3c   :  { %v2914_v36 = vpop.xlane.xlu0 %2913 }
0x1f3d   :  { %v2915_v55 = vmul.f32 0.03125, %v2914_v36 }
0x1f3f   :  { %v2916_v53 = vsub.f32 %v2911_v7, %v2915_v55 }
0x1f41   :  { %v2917_v9 = vmul.f32 %v2916_v53, %v2916_v53 }
0x1f43   :  { %v2918_v51 = vsel %vm171_vm1, %v2917_v9, 0.0  ;;  %vm4038_vm1 = vmmov 0  }
0x1f44   :  { %2919 = vadd.xlane.f32.xlu1 %v2918_v51  ;;  %3550 = vmatprep.mubr.msk.f32.mxu1 %vm4038_vm1, %v4039_v17 }
0x1fd1   :  { %v2920_v21 = vpop.xlane.xlu1 %2919 }
0x1fd2   :  { %v2921_v23 = vmul.f32 0.03125, %v2920_v21 }
0x1fd4   :  { %v2922_v27 = vadd.f32 1e-05, %v2921_v23 }
0x1fd6   :  { %3966 = vrsqrt.f32 %v2922_v27 }
0x1fe0   :  { %v3967_v29 = vpop.eup %3966 }
0x1fe1   :  { %v2924_v48 = vmul.f32 %v3967_v29, %v2916_v53 }
0x1fe3   :  { %3551 = vmatmul.mubr.msk.f32.vlgmr.msra.gmra.mrb[30].mxu1 %vm167_vm0, %v2924_v48 }
0x20b6   :  { %v3005_v58 = vpop.f32.mrb[30].mxu1 }
0x20b7   :  { %v3006_v30 = vadd.f32 %v3161_v12, %v3005_v58  ;;  %v3552_v39 = vpop.f32.mrb[31].mxu1 }
0x20b9   :  { %3009 = vst.msk [vmem:[#allocation2] sm:$0x3] %vm398_vm5, %v3006_v30  ;;  %v3010_v61 = vmul.f32 %v3006_v30, %v3006_v30 }
0x20bb   :  { %3012 = vrot.lane.b32.xlu0 %v3010_v61, %s4040_s12 }
0x212d   :  { %v3013_v41 = vpop.permute.xlu0 %3012 }
0x212e   :  { %v3016_v31 = vsel %vm3015_vm3, %v3013_v41, 0.0 }
0x212f   :  { %3017 = vadd.xlane.f32.xlu1 %v3016_v31 }
0x21bc   :  { %v3018_v14 = vpop.xlane.xlu1 %3017 }
0x21bd   :  { %3968 = vrsqrt.f32 %v3018_v14  ;;  %vm3021_vm0 = vcmp.eq.f32.partialorder %v3018_v14, inf  ;;  %v3024_v13 = vand.u32 2147483648, %v3018_v14  ;;  %vm3023_vm4 = vcmp.eq.f32.partialorder %v3018_v14, 0.0 }
0x21c7   :  { %v3969_v32 = vpop.eup %3968 }
0x21c8   :  { %v3020_v33 = vmul.f32 %v3969_v32, %v3018_v14 }
0x21ca   :  { %v3022_v34 = vsel %vm3021_vm0, %v3018_v14, %v3020_v33 }
0x21cb   :  { %v3025_v37 = vsel %vm3023_vm4, %v3024_v13, %v3022_v34 }
0x21cc   :  { %v3026_v18 = vmax.f32 %v3025_v37, 1e-12 }
0x21ce   :  { %3970 = vrcp.f32 %v3026_v18 }
0x21cf   :  { %3985 = shalt.err (!%p3982_p4)
}
0x21d0   :  { %s3986_s19 = scalar_lea.hbm %s4845_s14, 32 }
0x21d1   :  { %p3987_p5 = scmp.ne.s32.totalorder %s4845_s14, %s3986_s19  ;;  %p3990_p6 = scmp.lt.u32.totalorder %s3986_s19, %s4845_s14 }
0x21d3   :  { %p3992_p7 = pnand %p3990_p6, %p3987_p5 }
0x21d5   :  { %3995 = shalt.err (!%p3992_p7)
}
0x21d6   :  { %3043 = dma.vmem_to_hbm [thread:$0]  %s3041_s2, 32, %s4845_s14, [#allocation3]  }
0x21d7   :  { %s4042_s3 = smov [#allocation4]  }
0x21d8   :  { %v3971_v38 = vpop.eup %3970  ;;  %s3050_s18 = sshll.u32 %s4042_s3, 4  ;;  %s3051_s18 = int_to_ptr.vmem [resolvable:$true] %s3050_s18 }
0x21d9   :  { %v3028_v40 = vmul.f32 %v3971_v38, %v3006_v30  ;;  %s3996_s5 = scalar_lea.vmem %s3051_s18, 32  ;;  %p4001_p9 = scmp.lt.s32.totalorder %s3051_s18, %s3051_s18 }
0x21da   :  { %p3997_p8 = scmp.ne.s32.totalorder %s3051_s18, %s3996_s5  ;;  %p4002_p10 = scmp.lt.s32.totalorder %s3996_s5, %s3996_s5 }
0x21db   :  { %3030 = vrot.lane.b32.xlu1 %v3028_v40, %s4040_s12 }
0x21dc   :  { %p4003_p11 = por %p4002_p10, %p4001_p9 }
0x21de   :  { %p4004_p12 = pnand %p4003_p11, %p3997_p8 }
0x224d   :  { %v3031_v19 = vpop.permute.xlu1 %3030 }
0x224e   :  { %3033 = vst.msk [vmem:[#allocation4] sm:$0x3] %vm3015_vm3, %v3031_v19 }
0x224f   :  { %4007 = shalt.err (!%p4004_p12)
}
0x2250   :  { %s4008_s14 = scalar_lea.hbm %s4846_s15, 32 }
0x2251   :  { %p4009_p13 = scmp.ne.s32.totalorder %s4846_s15, %s4008_s14  ;;  %p4012_p0 = scmp.lt.u32.totalorder %s4008_s14, %s4846_s15 }
0x2253   :  { %p4014_p1 = pnand %p4012_p0, %p4009_p13 }
0x2255   :  { %4017 = shalt.err (!%p4014_p1)
}
0x2256   :  { %3053 = dma.vmem_to_hbm [thread:$0]  %s3051_s18, 32, %s4846_s15, [#allocation5]  }
0x2257   :  { %4018 = dma.done.wait [#allocation3], 32  }
0x2258   :  { %4019 = vsyncadd [#allocation3], 4294967264 }
0x2259   :  { %4020 = dma.done.wait [#allocation5], 32  }
0x225a   :  { %4021 = vsyncadd [#allocation5], 4294967264 }
0x225b   :  { %3060 = vsyncpa [#allocation3], 1 }
0x225c   :  { %3061 = vsyncpa [#allocation5], 1 }

</bundles_post_ra>
